<compile_context>
chip_gen: v5e
topology: v5e:2x2
jax: 0.10.0
libtpu: 0.0.40
codegen_flags: <defaults>
</compile_context>

<pallas_src>
import math

import jax
import jax.numpy as jnp
from jax.experimental import pallas as pl
from jax.experimental.pallas import tpu as pltpu

# ---------------- mini-BART config ----------------
VOCAB = 128
D_MODEL = 32
N_HEADS = 4
HEAD_DIM = D_MODEL // N_HEADS
FFN_DIM = 64
MAX_POS = 32
PAD_ID = 1
DEC_START_ID = 2
NEG_INF = -1e9
LN_EPS = 1e-5

# ---------------- packed-slab layouts (all static) ----------------
# attn_w (bf16) [12, H, Dh, D]: idx 3*m+j = projection j (q,k,v) of module m,
#                               idx 9+m   = output projection of module m.
#   modules: 0 = enc.sa, 1 = dec.sa, 2 = dec.ca
# wb64 (bf16) [2*D, FFN]: fc1 weights.
R_ENC_FC1 = 0
R_DEC_FC1 = D_MODEL
# wb32 (bf16) [V + 2*FFN, D]: shared embedding table + fc2 weights.
R_SHARED = 0
R_ENC_FC2 = VOCAB
R_DEC_FC2 = VOCAB + FFN_DIM
# vecs (f32) [VEC_ROWS, 128]: positions, LN params, biases (one row each),
# and head-major q/k/v biases.
V_ENC_POS = 0
V_DEC_POS = MAX_POS
SINGLES0 = 2 * MAX_POS
SINGLES_ORDER = (
    "enc.ln_emb.g", "enc.ln_emb.b", "enc.sa_ln.g", "enc.sa_ln.b",
    "enc.final_ln.g", "enc.final_ln.b",
    "dec.ln_emb.g", "dec.ln_emb.b", "dec.sa_ln.g", "dec.sa_ln.b",
    "dec.ca_ln.g", "dec.ca_ln.b", "dec.final_ln.g", "dec.final_ln.b",
    "enc.sa.o_b", "dec.sa.o_b", "dec.ca.o_b",
    "enc.fc2_b", "dec.fc2_b", "enc.fc1_b", "dec.fc1_b",
    "final_logits_bias",
)
SINGLE_ROW = {n: SINGLES0 + i for i, n in enumerate(SINGLES_ORDER)}
QKVB0 = SINGLES0 + 24          # head-major q/k/v biases: 9 projections x H rows
VEC_ROWS = 128

O_B_NAMES = ("enc.sa.o_b", "dec.sa.o_b", "dec.ca.o_b")


# ================= the fused Pallas kernel (one batch element per step) ======

def _bart_fused_kernel(ids_ref, amask_ref, dec_ids_ref, labels_ref,
                       attn_w_ref, wb64_ref, wb32_ref, vec_ref,
                       loss_ref, logits_ref):
    f32, bf16 = jnp.float32, jnp.bfloat16
    D, H, Dh, V, F = D_MODEL, N_HEADS, HEAD_DIM, VOCAB, FFN_DIM
    S = ids_ref.shape[0]
    T = dec_ids_ref.shape[0]

    def dot(a, b):                       # bf16 MXU operands, f32 accumulation
        return jnp.dot(a.astype(bf16), b, preferred_element_type=f32)

    def vrow(name, width):               # one packed f32 vector row
        r = SINGLE_ROW[name]
        return vec_ref[r:r + 1, :width]

    def layernorm(x, name):              # f32 elementwise (v5e-safe)
        g = vrow(name + ".g", D)
        b = vrow(name + ".b", D)
        mu = jnp.mean(x, axis=-1, keepdims=True)
        var = jnp.mean((x - mu) ** 2, axis=-1, keepdims=True)
        return (x - mu) * jax.lax.rsqrt(var + LN_EPS) * g + b

    def softmax_last(s):
        m = jnp.max(s, axis=-1, keepdims=True)
        e = jnp.exp(s - m)
        # EUP reciprocal; probabilities sum to 1 only approximately.
        return e * pl.reciprocal(jnp.sum(e, axis=-1, keepdims=True), approx=True)

    def gelu(x):
        # tanh-approx GELU (EUP tanh, keeps VALU free). ~1e-3 deviation from
        # torch's exact erf GELU used by BART.
        c = math.sqrt(2.0 / math.pi)
        return 0.5 * x * (1.0 + jnp.tanh(c * (x + 0.044715 * x * x * x)))

    shared = wb32_ref[R_SHARED:R_SHARED + V, :]              # [V, D] bf16
    # hoisted token iota: reused by both embeddings and the CE gather
    tok_iota = jax.lax.broadcasted_iota(jnp.int32, (max(S, T), V), 1)

    def embed(ids_col, pos_row0, n):
        # embedding lookup as a one-hot MXU matmul (no gather in-kernel)
        onehot = (tok_iota[:n, :] == ids_col).astype(bf16)   # [n, V]
        emb = jnp.dot(onehot, shared, preferred_element_type=f32)
        # TODO(synk): HF BartLearnedPositionalEmbedding uses an index offset
        # of 2; omitted here (weights are self-initialized, not HF checkpoints).
        return emb + vec_ref[pos_row0:pos_row0 + n, :D]

    def attention(x_q, x_kv, mod, bias, self_attn):
        Tq = x_q.shape[0]
        Tk = x_kv.shape[0]
        xq = jnp.broadcast_to(x_q.astype(bf16)[None], (H, Tq, D))
        xk = xq if self_attn else jnp.broadcast_to(x_kv.astype(bf16)[None], (H, Tk, D))

        def proj(xh, j):                 # head-major projection, no lane slicing
            w = attn_w_ref[3 * mod + j]                      # [H, Dh, D] bf16
            r0 = QKVB0 + (3 * mod + j) * H
            b = vec_ref[r0:r0 + H, :Dh]                      # [H, Dh] f32
            y = jnp.einsum("htd,hed->hte", xh, w, preferred_element_type=f32)
            return y + b[:, None, :]

        qh = proj(xq, 0)                                     # [H, Tq, Dh] (pre-scaled)
        kh = proj(xk, 1)                                     # [H, Tk, Dh]
        vh = proj(xk, 2)
        # heads batched into single einsums (no per-head python loop / concat)
        s = jnp.einsum("hqe,hke->hqk", qh, kh, preferred_element_type=f32) + bias
        p = softmax_last(s)
        ctx = jnp.einsum("hqk,hke->hqe", p, vh, preferred_element_type=f32)
        wo = attn_w_ref[9 + mod]                             # [H, Dh, D] bf16
        parts = jnp.einsum("hqe,hed->hqd", ctx.astype(bf16), wo,
                           preferred_element_type=f32)       # [H, Tq, D]
        out = jnp.sum(parts, axis=0)                         # concat folded into o_w
        return out + vrow(O_B_NAMES[mod], D)

    def ffn(x, fc1_r0, fc1_b, fc2_r0, fc2_b):
        h1 = gelu(dot(x, wb64_ref[fc1_r0:fc1_r0 + D, :]) + vrow(fc1_b, F))
        return dot(h1, wb32_ref[fc2_r0:fc2_r0 + F, :]) + vrow(fc2_b, D)

    # ------- attention biases built in-kernel (never materialized in HBM) ----
    am = amask_ref[...]                                      # [1, 1, S] f32, 1=keep
    enc_bias = (1.0 - am) * NEG_INF                          # broadcasts over (H, Tq)
    r_i = jax.lax.broadcasted_iota(jnp.int32, (T, T), 0)
    c_i = jax.lax.broadcasted_iota(jnp.int32, (T, T), 1)
    causal = jnp.where(c_i <= r_i, 0.0, NEG_INF).astype(f32)[None, :, :]
    # TODO(synk): no decoder padding mask (HF uses causal-only when
    # decoder_attention_mask is None, which matches this usage).

    # ------- encoder (1 layer, post-LN) -------
    h_e = layernorm(embed(ids_ref[...], V_ENC_POS, S), "enc.ln_emb")
    h_e = layernorm(h_e + attention(h_e, h_e, 0, enc_bias, True), "enc.sa_ln")
    enc_out = layernorm(h_e + ffn(h_e, R_ENC_FC1, "enc.fc1_b",
                                  R_ENC_FC2, "enc.fc2_b"), "enc.final_ln")

    # ------- decoder (1 layer: self-attn, cross-attn, FFN) -------
    h_d = layernorm(embed(dec_ids_ref[...], V_DEC_POS, T), "dec.ln_emb")
    h_d = layernorm(h_d + attention(h_d, h_d, 1, causal, True), "dec.sa_ln")
    h_d = layernorm(h_d + attention(h_d, enc_out, 2, enc_bias, False), "dec.ca_ln")
    dec_out = layernorm(h_d + ffn(h_d, R_DEC_FC1, "dec.fc1_b",
                                  R_DEC_FC2, "dec.fc2_b"), "dec.final_ln")

    # ------- tied LM head: contract D axis of the [V, D] table (no transpose) -
    logits = jax.lax.dot_general(
        dec_out.astype(bf16), shared,
        dimension_numbers=(((1,), (1,)), ((), ())),
        preferred_element_type=f32) + vrow("final_logits_bias", V)
    logits_ref[...] = logits                                 # lane-dense [T, 128]

    # ------- cross-entropy partial sum for this batch element -----------------
    labels_col = labels_ref[...]                             # [T, 1] int32
    m = jnp.max(logits, axis=-1, keepdims=True)
    lse = jnp.log(jnp.sum(jnp.exp(logits - m), axis=-1, keepdims=True)) + m
    picked = jnp.sum(jnp.where(tok_iota[:T, :] == labels_col, logits, 0.0),
                     axis=-1, keepdims=True)
    # TODO(synk): HF BART uses ignore_index=-100; all label tokens here are valid.
    total = jnp.sum(lse - picked, keepdims=True)             # [1, 1]
    loss_ref[...] = jnp.broadcast_to(total.reshape(1, 1, 1), (1, 1, 128))


# ================= host-side parameter handling =================

def init_params(seed=12345):
    key = jax.random.PRNGKey(seed)
    params = {}

    def add(name, shape, scale=0.02):
        nonlocal key
        key, sub = jax.random.split(key)
        params[name] = jax.random.normal(sub, shape, jnp.float32) * scale

    def add_ln(name):
        params[name + ".g"] = jnp.ones((D_MODEL,), jnp.float32)
        params[name + ".b"] = jnp.zeros((D_MODEL,), jnp.float32)

    add("shared", (VOCAB, D_MODEL))
    add("enc_pos", (MAX_POS, D_MODEL))
    add("dec_pos", (MAX_POS, D_MODEL))
    add_ln("enc.ln_emb")
    add_ln("dec.ln_emb")

    def add_attn(prefix):
        add(prefix + "qkv_w", (D_MODEL, 3 * D_MODEL))        # fused Q|K|V
        params[prefix + "qkv_b"] = jnp.zeros((3 * D_MODEL,), jnp.float32)
        add(prefix + "o_w", (D_MODEL, D_MODEL))
        params[prefix + "o_b"] = jnp.zeros((D_MODEL,), jnp.float32)

    def add_ffn(prefix):
        add(prefix + "fc1_w", (D_MODEL, FFN_DIM))
        params[prefix + "fc1_b"] = jnp.zeros((FFN_DIM,), jnp.float32)
        add(prefix + "fc2_w", (FFN_DIM, D_MODEL))
        params[prefix + "fc2_b"] = jnp.zeros((D_MODEL,), jnp.float32)

    add_attn("enc.sa."); add_ln("enc.sa_ln"); add_ffn("enc."); add_ln("enc.final_ln")
    add_attn("dec.sa."); add_ln("dec.sa_ln")
    add_attn("dec.ca."); add_ln("dec.ca_ln")
    add_ffn("dec."); add_ln("dec.final_ln")

    params["final_logits_bias"] = jnp.zeros((VOCAB,), jnp.float32)
    return params


def pack_params(params):
    """One-time prep: pack 39 tiny params into 4 lane-dense slabs.

    Attention weights become head-major & transposed ([H, Dh, D]) with the
    1/sqrt(Dh) score scale folded into the Q weights/bias.  Matmul weights are
    stored bf16; elementwise vectors stay f32.
    """
    f32, bf16 = jnp.float32, jnp.bfloat16
    D, H, Dh = D_MODEL, N_HEADS, HEAD_DIM
    scale = 1.0 / math.sqrt(Dh)

    def head_major(w_cols):              # [D, H*Dh] -> [H, Dh, D]
        return jnp.transpose(w_cols.reshape(D, H, Dh), (1, 2, 0))

    blocks = []
    for mod in ("enc.sa.", "dec.sa.", "dec.ca."):
        w = params[mod + "qkv_w"]
        blocks.append(head_major(w[:, :D]) * scale)          # Q (pre-scaled)
        blocks.append(head_major(w[:, D:2 * D]))             # K
        blocks.append(head_major(w[:, 2 * D:]))              # V
    for mod in ("enc.sa.", "dec.sa.", "dec.ca."):
        blocks.append(params[mod + "o_w"].reshape(H, Dh, D)) # O (head-major rows)
    attn_w = jnp.stack(blocks, axis=0).astype(bf16)          # [12, H, Dh, D]

    wb64 = jnp.concatenate([params["enc.fc1_w"], params["dec.fc1_w"]],
                           axis=0).astype(bf16)              # [2D, FFN]
    wb32 = jnp.concatenate([params["shared"], params["enc.fc2_w"],
                            params["dec.fc2_w"]], axis=0).astype(bf16)  # [V+2F, D]

    vec = jnp.zeros((VEC_ROWS, 128), f32)
    vec = vec.at[V_ENC_POS:V_ENC_POS + MAX_POS, :D].set(params["enc_pos"])
    vec = vec.at[V_DEC_POS:V_DEC_POS + MAX_POS, :D].set(params["dec_pos"])
    for name in SINGLES_ORDER:
        v = params[name].reshape(-1).astype(f32)
        vec = vec.at[SINGLE_ROW[name], :v.shape[0]].set(v)
    for mi, mod in enumerate(("enc.sa.", "dec.sa.", "dec.ca.")):
        b = params[mod + "qkv_b"].astype(f32)
        parts = (b[:D].reshape(H, Dh) * scale,               # Q bias (pre-scaled)
                 b[D:2 * D].reshape(H, Dh),
                 b[2 * D:].reshape(H, Dh))
        for j, bj in enumerate(parts):
            r0 = QKVB0 + (mi * 3 + j) * H
            vec = vec.at[r0:r0 + H, :Dh].set(bj)
    return attn_w, wb64, wb32, vec


def shift_tokens_right(labels):
    """BART: decoder_input_ids = labels shifted right, start token prepended."""
    shifted = jnp.roll(labels, 1, axis=-1)
    return shifted.at[:, 0].set(DEC_START_ID)


def bart_forward(packed, input_ids, attention_mask, out_ids):
    attn_w, wb64, wb32, vecs = packed
    B, S = input_ids.shape
    T = out_ids.shape[1]
    assert S <= MAX_POS and T <= MAX_POS and S % 8 == 0 and T % 8 == 0

    ids_col = input_ids.reshape(B * S, 1).astype(jnp.int32)
    dec_col = shift_tokens_right(out_ids).reshape(B * T, 1).astype(jnp.int32)
    labels_col = out_ids.reshape(B * T, 1).astype(jnp.int32)
    amask3 = attention_mask.astype(jnp.float32).reshape(B, 1, S)

    grid_spec = pltpu.PrefetchScalarGridSpec(
        num_scalar_prefetch=0,
        grid=(B,),
        in_specs=[
            pl.BlockSpec((S, 1), lambda b: (b, 0)),                  # enc ids
            pl.BlockSpec((1, 1, S), lambda b: (b, 0, 0)),            # attention mask
            pl.BlockSpec((T, 1), lambda b: (b, 0)),                  # dec ids
            pl.BlockSpec((T, 1), lambda b: (b, 0)),                  # labels
            pl.BlockSpec((12, N_HEADS, HEAD_DIM, D_MODEL), lambda b: (0, 0, 0, 0)),
            pl.BlockSpec((2 * D_MODEL, FFN_DIM), lambda b: (0, 0)),
            pl.BlockSpec((VOCAB + 2 * FFN_DIM, D_MODEL), lambda b: (0, 0)),
            pl.BlockSpec((VEC_ROWS, 128), lambda b: (0, 0)),
        ],
        out_specs=[
            pl.BlockSpec((1, 1, 128), lambda b: (b, 0, 0)),          # per-batch loss row
            pl.BlockSpec((T, VOCAB), lambda b: (b, 0)),              # logits (lane-dense)
        ],
    )

    matmul_flops = 2 * ((S + T) * VOCAB * D_MODEL
                        + 9 * N_HEADS * T * D_MODEL * HEAD_DIM
                        + 6 * N_HEADS * T * T * HEAD_DIM
                        + 3 * N_HEADS * T * HEAD_DIM * D_MODEL
                        + 4 * T * D_MODEL * FFN_DIM
                        + T * D_MODEL * VOCAB)
    cost = pl.CostEstimate(
        flops=B * matmul_flops,
        transcendentals=B * (3 * N_HEADS * T * T + T * VOCAB + 2 * T * FFN_DIM),
        bytes_accessed=(attn_w.size * 2 + wb64.size * 2 + wb32.size * 2
                        + vecs.size * 4 + B * T * VOCAB * 4
                        + 4 * B * (2 * S + 3 * T) + B * 512),
    )

    loss_rows, logits2d = pl.pallas_call(
        _bart_fused_kernel,
        out_shape=(
            jax.ShapeDtypeStruct((B, 1, 128), jnp.float32),
            jax.ShapeDtypeStruct((B * T, VOCAB), jnp.float32),
        ),
        grid_spec=grid_spec,
        compiler_params=pltpu.CompilerParams(
            dimension_semantics=("parallel",),
            vmem_limit_bytes=4 * 1024 * 1024,
        ),
        cost_estimate=cost,
    )(ids_col, amask3, dec_col, labels_col, attn_w, wb64, wb32, vecs)

    loss = jnp.sum(loss_rows[:, 0, 0]) / (B * T)   # mean over all label tokens
    return loss, logits2d.reshape(B, T, VOCAB)


# ================= demo =================

if __name__ == "__main__":
    B, S, T = 2, 8, 8
    key = jax.random.PRNGKey(0)
    k1, k2 = jax.random.split(key, 2)

    input_ids = jax.random.randint(k1, (B, S), 3, VOCAB, dtype=jnp.int32)
    out_ids = jax.random.randint(k2, (B, T), 3, VOCAB, dtype=jnp.int32)
    attention_mask = jnp.ones((B, S), jnp.int32).at[1, S - 2:].set(0)  # pad tail
    input_ids = input_ids.at[1, S - 2:].set(PAD_ID)

    params = init_params()
    packed = pack_params(params)          # one-time parameter prep (outside jit)

    fwd = jax.jit(bart_forward)
    loss, logits = fwd(packed, input_ids, attention_mask, out_ids)
    jax.block_until_ready((loss, logits))

    assert logits.shape == (B, T, VOCAB)
    assert loss.shape == ()
    assert bool(jnp.isfinite(loss))
    assert bool(jnp.all(jnp.isfinite(logits)))
    print("KERNEL_OK")
</pallas_src>

<mosaic_0001>
module attributes {stable_mosaic.version = 11 : i64} {
  func.func @_bart_fused_kernel(%arg0: i32, %arg1: memref<8x1xi32, #tpu.memory_space<vmem>>, %arg2: memref<1x1x8xf32, #tpu.memory_space<vmem>>, %arg3: memref<8x1xi32, #tpu.memory_space<vmem>>, %arg4: memref<8x1xi32, #tpu.memory_space<vmem>>, %arg5: memref<12x4x8x32xbf16, #tpu.memory_space<vmem>>, %arg6: memref<64x64xbf16, #tpu.memory_space<vmem>>, %arg7: memref<256x32xbf16, #tpu.memory_space<vmem>>, %arg8: memref<128x128xf32, #tpu.memory_space<vmem>>, %arg9: memref<1x1x128xf32, #tpu.memory_space<vmem>>, %arg10: memref<8x128xf32, #tpu.memory_space<vmem>>) attributes {dimension_semantics = [#tpu.dimension_semantics<parallel>], iteration_bounds = array<i64: 2>, scalar_prefetch = 0 : i64, scratch_operands = 0 : i64, tpu.core_type = #tpu.core_type<tc>, window_params = [{transform_indices = @transform_0, window_bounds = array<i64: 8, 1>}, {transform_indices = @transform_1, window_bounds = array<i64: 1, 1, 8>}, {transform_indices = @transform_2, window_bounds = array<i64: 8, 1>}, {transform_indices = @transform_3, window_bounds = array<i64: 8, 1>}, {pipeline_mode = #tpu.pipeline_mode<synchronous>, transform_indices = @transform_4, window_bounds = array<i64: 12, 4, 8, 32>}, {pipeline_mode = #tpu.pipeline_mode<synchronous>, transform_indices = @transform_5, window_bounds = array<i64: 64, 64>}, {pipeline_mode = #tpu.pipeline_mode<synchronous>, transform_indices = @transform_6, window_bounds = array<i64: 256, 32>}, {pipeline_mode = #tpu.pipeline_mode<synchronous>, transform_indices = @transform_7, window_bounds = array<i64: 128, 128>}, {transform_indices = @transform_8, window_bounds = array<i64: 1, 1, 128>}, {transform_indices = @transform_9, window_bounds = array<i64: 8, 128>}]} {
    %c0 = arith.constant 0 : index
    %c0_0 = arith.constant 0 : index
    %0 = vector.load %arg7[%c0, %c0_0] : memref<256x32xbf16, #tpu.memory_space<vmem>>, vector<128x32xbf16>
    %1 = tpu.iota {dimensions = array<i32: 1>} : vector<8x128xi32>
    %c0_1 = arith.constant 0 : index
    %c0_2 = arith.constant 0 : index
    %c0_3 = arith.constant 0 : index
    %2 = vector.load %arg2[%c0_1, %c0_2, %c0_3] : memref<1x1x8xf32, #tpu.memory_space<vmem>>, vector<1x1x8xf32>
    %cst = arith.constant 1.000000e+00 : f32
    %3 = vector.broadcast %cst : f32 to vector<1x1x8xf32>
    %4 = arith.subf %3, %2 : vector<1x1x8xf32>
    %cst_4 = arith.constant -1.000000e+09 : f32
    %5 = vector.broadcast %cst_4 : f32 to vector<1x1x8xf32>
    %6 = arith.mulf %4, %5 : vector<1x1x8xf32>
    %7 = tpu.iota {dimensions = array<i32: 0>} : vector<8x8xi32>
    %8 = tpu.iota {dimensions = array<i32: 1>} : vector<8x8xi32>
    %9 = arith.cmpi sle, %8, %7 : vector<8x8xi32>
    %cst_5 = arith.constant 0.000000e+00 : f32
    %cst_6 = arith.constant -1.000000e+09 : f32
    %10 = vector.broadcast %cst_5 : f32 to vector<8x8xf32>
    %11 = vector.broadcast %cst_6 : f32 to vector<8x8xf32>
    %12 = arith.select %9, %10, %11 : vector<8x8xi1>, vector<8x8xf32>
    %13 = vector.shape_cast %12 : vector<8x8xf32> to vector<1x8x8xf32>
    %c0_7 = arith.constant 0 : index
    %c0_8 = arith.constant 0 : index
    %14 = vector.load %arg1[%c0_7, %c0_8] : memref<8x1xi32, #tpu.memory_space<vmem>>, vector<8x1xi32>
    %15 = vector.broadcast %14 : vector<8x1xi32> to vector<8x128xi32>
    %16 = arith.cmpi eq, %1, %15 : vector<8x128xi32>
    %17 = arith.extui %16 : vector<8x128xi1> to vector<8x128xi32>
    %18 = arith.sitofp %17 : vector<8x128xi32> to vector<8x128xf32>
    %19 = arith.truncf %18 : vector<8x128xf32> to vector<8x128xbf16>
    %cst_9 = arith.constant dense<0.000000e+00> : vector<8x32xf32>
    %20 = tpu.matmul %19, %0, %cst_9 {dimension_numbers = #tpu.dot_dimension_numbers<[1], [0], [0], [1], [0, 0, 1, 1], [], []>} : vector<8x128xbf16>, vector<128x32xbf16>, vector<8x32xf32> -> vector<8x32xf32>
    %c0_10 = arith.constant 0 : index
    %c0_11 = arith.constant 0 : index
    %21 = vector.load %arg8[%c0_10, %c0_11] : memref<128x128xf32, #tpu.memory_space<vmem>>, vector<8x32xf32>
    %22 = arith.addf %20, %21 : vector<8x32xf32>
    %c64 = arith.constant 64 : index
    %c0_12 = arith.constant 0 : index
    %23 = vector.load %arg8[%c64, %c0_12] : memref<128x128xf32, #tpu.memory_space<vmem>>, vector<1x32xf32>
    %c65 = arith.constant 65 : index
    %c0_13 = arith.constant 0 : index
    %24 = vector.load %arg8[%c65, %c0_13] : memref<128x128xf32, #tpu.memory_space<vmem>>, vector<1x32xf32>
    %cst_14 = arith.constant dense<0.000000e+00> : vector<8xf32>
    %25 = vector.multi_reduction <add>, %22, %cst_14 [1] : vector<8x32xf32> to vector<8xf32>
    %26 = vector.shape_cast %25 : vector<8xf32> to vector<8x1xf32>
    %cst_15 = arith.constant 3.200000e+01 : f32
    %27 = vector.broadcast %cst_15 : f32 to vector<8x1xf32>
    %28 = arith.divf %26, %27 : vector<8x1xf32>
    %29 = vector.broadcast %28 : vector<8x1xf32> to vector<8x32xf32>
    %30 = arith.subf %22, %29 : vector<8x32xf32>
    %31 = arith.mulf %30, %30 : vector<8x32xf32>
    %cst_16 = arith.constant dense<0.000000e+00> : vector<8xf32>
    %32 = vector.multi_reduction <add>, %31, %cst_16 [1] : vector<8x32xf32> to vector<8xf32>
    %33 = vector.shape_cast %32 : vector<8xf32> to vector<8x1xf32>
    %cst_17 = arith.constant 3.200000e+01 : f32
    %34 = vector.broadcast %cst_17 : f32 to vector<8x1xf32>
    %35 = arith.divf %33, %34 : vector<8x1xf32>
    %36 = vector.broadcast %28 : vector<8x1xf32> to vector<8x32xf32>
    %37 = arith.subf %22, %36 : vector<8x32xf32>
    %cst_18 = arith.constant 9.99999974E-6 : f32
    %38 = vector.broadcast %cst_18 : f32 to vector<8x1xf32>
    %39 = arith.addf %35, %38 : vector<8x1xf32>
    %40 = math.rsqrt %39 : vector<8x1xf32>
    %41 = vector.broadcast %40 : vector<8x1xf32> to vector<8x32xf32>
    %42 = arith.mulf %37, %41 : vector<8x32xf32>
    %43 = vector.broadcast %23 : vector<1x32xf32> to vector<8x32xf32>
    %44 = arith.mulf %42, %43 : vector<8x32xf32>
    %45 = vector.broadcast %24 : vector<1x32xf32> to vector<8x32xf32>
    %46 = arith.addf %44, %45 : vector<8x32xf32>
    %47 = arith.truncf %46 : vector<8x32xf32> to vector<8x32xbf16>
    %48 = vector.shape_cast %47 : vector<8x32xbf16> to vector<1x8x32xbf16>
    %49 = vector.shape_cast %48 : vector<1x8x32xbf16> to vector<1x8x32xbf16>
    %50 = vector.broadcast %49 : vector<1x8x32xbf16> to vector<4x8x32xbf16>
    %c0_19 = arith.constant 0 : index
    %c0_20 = arith.constant 0 : index
    %c0_21 = arith.constant 0 : index
    %c0_22 = arith.constant 0 : index
    %51 = vector.load %arg5[%c0_19, %c0_20, %c0_21, %c0_22] : memref<12x4x8x32xbf16, #tpu.memory_space<vmem>>, vector<1x4x8x32xbf16>
    %52 = vector.shape_cast %51 : vector<1x4x8x32xbf16> to vector<4x8x32xbf16>
    %c88 = arith.constant 88 : index
    %c0_23 = arith.constant 0 : index
    %53 = vector.load %arg8[%c88, %c0_23] : memref<128x128xf32, #tpu.memory_space<vmem>>, vector<4x8xf32>
    "tpu.trace_start"() <{level = 10 : i32, message = "htd,hed->hte"}> : () -> ()
    %cst_24 = arith.constant dense<0.000000e+00> : vector<4x8x8xf32>
    %54 = tpu.matmul %50, %52, %cst_24 {dimension_numbers = #tpu.dot_dimension_numbers<[2], [2], [1], [1], [0, 0, 0, 1, 1, 1], [0], [0]>} : vector<4x8x32xbf16>, vector<4x8x32xbf16>, vector<4x8x8xf32> -> vector<4x8x8xf32>
    "tpu.trace_stop"() : () -> ()
    %55 = vector.shape_cast %53 : vector<4x8xf32> to vector<4x1x8xf32>
    %56 = vector.broadcast %55 : vector<4x1x8xf32> to vector<4x8x8xf32>
    %57 = arith.addf %54, %56 : vector<4x8x8xf32>
    %c1 = arith.constant 1 : index
    %c0_25 = arith.constant 0 : index
    %c0_26 = arith.constant 0 : index
    %c0_27 = arith.constant 0 : index
    %58 = vector.load %arg5[%c1, %c0_25, %c0_26, %c0_27] : memref<12x4x8x32xbf16, #tpu.memory_space<vmem>>, vector<1x4x8x32xbf16>
    %59 = vector.shape_cast %58 : vector<1x4x8x32xbf16> to vector<4x8x32xbf16>
    %c92 = arith.constant 92 : index
    %c0_28 = arith.constant 0 : index
    %60 = vector.load %arg8[%c92, %c0_28] : memref<128x128xf32, #tpu.memory_space<vmem>>, vector<4x8xf32>
    "tpu.trace_start"() <{level = 10 : i32, message = "htd,hed->hte"}> : () -> ()
    %cst_29 = arith.constant dense<0.000000e+00> : vector<4x8x8xf32>
    %61 = tpu.matmul %50, %59, %cst_29 {dimension_numbers = #tpu.dot_dimension_numbers<[2], [2], [1], [1], [0, 0, 0, 1, 1, 1], [0], [0]>} : vector<4x8x32xbf16>, vector<4x8x32xbf16>, vector<4x8x8xf32> -> vector<4x8x8xf32>
    "tpu.trace_stop"() : () -> ()
    %62 = vector.shape_cast %60 : vector<4x8xf32> to vector<4x1x8xf32>
    %63 = vector.broadcast %62 : vector<4x1x8xf32> to vector<4x8x8xf32>
    %64 = arith.addf %61, %63 : vector<4x8x8xf32>
    %c2 = arith.constant 2 : index
    %c0_30 = arith.constant 0 : index
    %c0_31 = arith.constant 0 : index
    %c0_32 = arith.constant 0 : index
    %65 = vector.load %arg5[%c2, %c0_30, %c0_31, %c0_32] : memref<12x4x8x32xbf16, #tpu.memory_space<vmem>>, vector<1x4x8x32xbf16>
    %66 = vector.shape_cast %65 : vector<1x4x8x32xbf16> to vector<4x8x32xbf16>
    %c96 = arith.constant 96 : index
    %c0_33 = arith.constant 0 : index
    %67 = vector.load %arg8[%c96, %c0_33] : memref<128x128xf32, #tpu.memory_space<vmem>>, vector<4x8xf32>
    "tpu.trace_start"() <{level = 10 : i32, message = "htd,hed->hte"}> : () -> ()
    %cst_34 = arith.constant dense<0.000000e+00> : vector<4x8x8xf32>
    %68 = tpu.matmul %50, %66, %cst_34 {dimension_numbers = #tpu.dot_dimension_numbers<[2], [2], [1], [1], [0, 0, 0, 1, 1, 1], [0], [0]>} : vector<4x8x32xbf16>, vector<4x8x32xbf16>, vector<4x8x8xf32> -> vector<4x8x8xf32>
    "tpu.trace_stop"() : () -> ()
    %69 = vector.shape_cast %67 : vector<4x8xf32> to vector<4x1x8xf32>
    %70 = vector.broadcast %69 : vector<4x1x8xf32> to vector<4x8x8xf32>
    %71 = arith.addf %68, %70 : vector<4x8x8xf32>
    "tpu.trace_start"() <{level = 10 : i32, message = "hqe,hke->hqk"}> : () -> ()
    %cst_35 = arith.constant dense<0.000000e+00> : vector<4x8x8xf32>
    %72 = tpu.matmul %57, %64, %cst_35 {dimension_numbers = #tpu.dot_dimension_numbers<[2], [2], [1], [1], [0, 0, 0, 1, 1, 1], [0], [0]>} : vector<4x8x8xf32>, vector<4x8x8xf32>, vector<4x8x8xf32> -> vector<4x8x8xf32>
    "tpu.trace_stop"() : () -> ()
    %73 = vector.broadcast %6 : vector<1x1x8xf32> to vector<4x8x8xf32>
    %74 = arith.addf %72, %73 : vector<4x8x8xf32>
    %cst_36 = arith.constant dense<0xFF800000> : vector<4x8xf32>
    %75 = vector.multi_reduction <maximumf>, %74, %cst_36 [2] : vector<4x8x8xf32> to vector<4x8xf32>
    %76 = vector.shape_cast %75 : vector<4x8xf32> to vector<4x8x1xf32>
    %77 = vector.broadcast %76 : vector<4x8x1xf32> to vector<4x8x8xf32>
    %78 = arith.subf %74, %77 : vector<4x8x8xf32>
    %79 = math.exp %78 : vector<4x8x8xf32>
    %cst_37 = arith.constant dense<0.000000e+00> : vector<4x8xf32>
    %80 = vector.multi_reduction <add>, %79, %cst_37 [2] : vector<4x8x8xf32> to vector<4x8xf32>
    %81 = vector.shape_cast %80 : vector<4x8xf32> to vector<4x8x1xf32>
    %82 = tpu.reciprocal %81 {approx = true} : vector<4x8x1xf32> -> vector<4x8x1xf32>
    %83 = vector.broadcast %82 : vector<4x8x1xf32> to vector<4x8x8xf32>
    %84 = arith.mulf %79, %83 : vector<4x8x8xf32>
    "tpu.trace_start"() <{level = 10 : i32, message = "hqk,hke->hqe"}> : () -> ()
    %cst_38 = arith.constant dense<0.000000e+00> : vector<4x8x8xf32>
    %85 = tpu.matmul %84, %71, %cst_38 {dimension_numbers = #tpu.dot_dimension_numbers<[2], [1], [1], [2], [0, 0, 0, 1, 1, 2], [0], [0]>} : vector<4x8x8xf32>, vector<4x8x8xf32>, vector<4x8x8xf32> -> vector<4x8x8xf32>
    "tpu.trace_stop"() : () -> ()
    %c9 = arith.constant 9 : index
    %c0_39 = arith.constant 0 : index
    %c0_40 = arith.constant 0 : index
    %c0_41 = arith.constant 0 : index
    %86 = vector.load %arg5[%c9, %c0_39, %c0_40, %c0_41] : memref<12x4x8x32xbf16, #tpu.memory_space<vmem>>, vector<1x4x8x32xbf16>
    %87 = vector.shape_cast %86 : vector<1x4x8x32xbf16> to vector<4x8x32xbf16>
    %88 = arith.truncf %85 : vector<4x8x8xf32> to vector<4x8x8xbf16>
    "tpu.trace_start"() <{level = 10 : i32, message = "hqe,hed->hqd"}> : () -> ()
    %cst_42 = arith.constant dense<0.000000e+00> : vector<4x8x32xf32>
    %89 = tpu.matmul %88, %87, %cst_42 {dimension_numbers = #tpu.dot_dimension_numbers<[2], [1], [1], [2], [0, 0, 0, 1, 1, 2], [0], [0]>} : vector<4x8x8xbf16>, vector<4x8x32xbf16>, vector<4x8x32xf32> -> vector<4x8x32xf32>
    "tpu.trace_stop"() : () -> ()
    %cst_43 = arith.constant dense<0.000000e+00> : vector<8x32xf32>
    %90 = vector.multi_reduction <add>, %89, %cst_43 [0] : vector<4x8x32xf32> to vector<8x32xf32>
    %c78 = arith.constant 78 : index
    %c0_44 = arith.constant 0 : index
    %91 = vector.load %arg8[%c78, %c0_44] : memref<128x128xf32, #tpu.memory_space<vmem>>, vector<1x32xf32>
    %92 = vector.broadcast %91 : vector<1x32xf32> to vector<8x32xf32>
    %93 = arith.addf %90, %92 : vector<8x32xf32>
    %94 = arith.addf %46, %93 : vector<8x32xf32>
    %c66 = arith.constant 66 : index
    %c0_45 = arith.constant 0 : index
    %95 = vector.load %arg8[%c66, %c0_45] : memref<128x128xf32, #tpu.memory_space<vmem>>, vector<1x32xf32>
    %c67 = arith.constant 67 : index
    %c0_46 = arith.constant 0 : index
    %96 = vector.load %arg8[%c67, %c0_46] : memref<128x128xf32, #tpu.memory_space<vmem>>, vector<1x32xf32>
    %cst_47 = arith.constant dense<0.000000e+00> : vector<8xf32>
    %97 = vector.multi_reduction <add>, %94, %cst_47 [1] : vector<8x32xf32> to vector<8xf32>
    %98 = vector.shape_cast %97 : vector<8xf32> to vector<8x1xf32>
    %cst_48 = arith.constant 3.200000e+01 : f32
    %99 = vector.broadcast %cst_48 : f32 to vector<8x1xf32>
    %100 = arith.divf %98, %99 : vector<8x1xf32>
    %101 = vector.broadcast %100 : vector<8x1xf32> to vector<8x32xf32>
    %102 = arith.subf %94, %101 : vector<8x32xf32>
    %103 = arith.mulf %102, %102 : vector<8x32xf32>
    %cst_49 = arith.constant dense<0.000000e+00> : vector<8xf32>
    %104 = vector.multi_reduction <add>, %103, %cst_49 [1] : vector<8x32xf32> to vector<8xf32>
    %105 = vector.shape_cast %104 : vector<8xf32> to vector<8x1xf32>
    %cst_50 = arith.constant 3.200000e+01 : f32
    %106 = vector.broadcast %cst_50 : f32 to vector<8x1xf32>
    %107 = arith.divf %105, %106 : vector<8x1xf32>
    %108 = vector.broadcast %100 : vector<8x1xf32> to vector<8x32xf32>
    %109 = arith.subf %94, %108 : vector<8x32xf32>
    %cst_51 = arith.constant 9.99999974E-6 : f32
    %110 = vector.broadcast %cst_51 : f32 to vector<8x1xf32>
    %111 = arith.addf %107, %110 : vector<8x1xf32>
    %112 = math.rsqrt %111 : vector<8x1xf32>
    %113 = vector.broadcast %112 : vector<8x1xf32> to vector<8x32xf32>
    %114 = arith.mulf %109, %113 : vector<8x32xf32>
    %115 = vector.broadcast %95 : vector<1x32xf32> to vector<8x32xf32>
    %116 = arith.mulf %114, %115 : vector<8x32xf32>
    %117 = vector.broadcast %96 : vector<1x32xf32> to vector<8x32xf32>
    %118 = arith.addf %116, %117 : vector<8x32xf32>
    %c0_52 = arith.constant 0 : index
    %c0_53 = arith.constant 0 : index
    %119 = vector.load %arg6[%c0_52, %c0_53] : memref<64x64xbf16, #tpu.memory_space<vmem>>, vector<32x64xbf16>
    %120 = arith.truncf %118 : vector<8x32xf32> to vector<8x32xbf16>
    %cst_54 = arith.constant dense<0.000000e+00> : vector<8x64xf32>
    %121 = tpu.matmul %120, %119, %cst_54 {dimension_numbers = #tpu.dot_dimension_numbers<[1], [0], [0], [1], [0, 0, 1, 1], [], []>} : vector<8x32xbf16>, vector<32x64xbf16>, vector<8x64xf32> -> vector<8x64xf32>
    %c83 = arith.constant 83 : index
    %c0_55 = arith.constant 0 : index
    %122 = vector.load %arg8[%c83, %c0_55] : memref<128x128xf32, #tpu.memory_space<vmem>>, vector<1x64xf32>
    %123 = vector.broadcast %122 : vector<1x64xf32> to vector<8x64xf32>
    %124 = arith.addf %121, %123 : vector<8x64xf32>
    %cst_56 = arith.constant 5.000000e-01 : f32
    %125 = vector.broadcast %cst_56 : f32 to vector<8x64xf32>
    %126 = arith.mulf %125, %124 : vector<8x64xf32>
    %cst_57 = arith.constant 4.471500e-02 : f32
    %127 = vector.broadcast %cst_57 : f32 to vector<8x64xf32>
    %128 = arith.mulf %127, %124 : vector<8x64xf32>
    %129 = arith.mulf %128, %124 : vector<8x64xf32>
    %130 = arith.mulf %129, %124 : vector<8x64xf32>
    %131 = arith.addf %124, %130 : vector<8x64xf32>
    %cst_58 = arith.constant 0.797884583 : f32
    %132 = vector.broadcast %cst_58 : f32 to vector<8x64xf32>
    %133 = arith.mulf %132, %131 : vector<8x64xf32>
    %134 = math.tanh %133 : vector<8x64xf32>
    %cst_59 = arith.constant 1.000000e+00 : f32
    %135 = vector.broadcast %cst_59 : f32 to vector<8x64xf32>
    %136 = arith.addf %135, %134 : vector<8x64xf32>
    %137 = arith.mulf %126, %136 : vector<8x64xf32>
    %c128 = arith.constant 128 : index
    %c0_60 = arith.constant 0 : index
    %138 = vector.load %arg7[%c128, %c0_60] : memref<256x32xbf16, #tpu.memory_space<vmem>>, vector<64x32xbf16>
    %139 = arith.truncf %137 : vector<8x64xf32> to vector<8x64xbf16>
    %cst_61 = arith.constant dense<0.000000e+00> : vector<8x32xf32>
    %140 = tpu.matmul %139, %138, %cst_61 {dimension_numbers = #tpu.dot_dimension_numbers<[1], [0], [0], [1], [0, 0, 1, 1], [], []>} : vector<8x64xbf16>, vector<64x32xbf16>, vector<8x32xf32> -> vector<8x32xf32>
    %c81 = arith.constant 81 : index
    %c0_62 = arith.constant 0 : index
    %141 = vector.load %arg8[%c81, %c0_62] : memref<128x128xf32, #tpu.memory_space<vmem>>, vector<1x32xf32>
    %142 = vector.broadcast %141 : vector<1x32xf32> to vector<8x32xf32>
    %143 = arith.addf %140, %142 : vector<8x32xf32>
    %144 = arith.addf %118, %143 : vector<8x32xf32>
    %c68 = arith.constant 68 : index
    %c0_63 = arith.constant 0 : index
    %145 = vector.load %arg8[%c68, %c0_63] : memref<128x128xf32, #tpu.memory_space<vmem>>, vector<1x32xf32>
    %c69 = arith.constant 69 : index
    %c0_64 = arith.constant 0 : index
    %146 = vector.load %arg8[%c69, %c0_64] : memref<128x128xf32, #tpu.memory_space<vmem>>, vector<1x32xf32>
    %cst_65 = arith.constant dense<0.000000e+00> : vector<8xf32>
    %147 = vector.multi_reduction <add>, %144, %cst_65 [1] : vector<8x32xf32> to vector<8xf32>
    %148 = vector.shape_cast %147 : vector<8xf32> to vector<8x1xf32>
    %cst_66 = arith.constant 3.200000e+01 : f32
    %149 = vector.broadcast %cst_66 : f32 to vector<8x1xf32>
    %150 = arith.divf %148, %149 : vector<8x1xf32>
    %151 = vector.broadcast %150 : vector<8x1xf32> to vector<8x32xf32>
    %152 = arith.subf %144, %151 : vector<8x32xf32>
    %153 = arith.mulf %152, %152 : vector<8x32xf32>
    %cst_67 = arith.constant dense<0.000000e+00> : vector<8xf32>
    %154 = vector.multi_reduction <add>, %153, %cst_67 [1] : vector<8x32xf32> to vector<8xf32>
    %155 = vector.shape_cast %154 : vector<8xf32> to vector<8x1xf32>
    %cst_68 = arith.constant 3.200000e+01 : f32
    %156 = vector.broadcast %cst_68 : f32 to vector<8x1xf32>
    %157 = arith.divf %155, %156 : vector<8x1xf32>
    %158 = vector.broadcast %150 : vector<8x1xf32> to vector<8x32xf32>
    %159 = arith.subf %144, %158 : vector<8x32xf32>
    %cst_69 = arith.constant 9.99999974E-6 : f32
    %160 = vector.broadcast %cst_69 : f32 to vector<8x1xf32>
    %161 = arith.addf %157, %160 : vector<8x1xf32>
    %162 = math.rsqrt %161 : vector<8x1xf32>
    %163 = vector.broadcast %162 : vector<8x1xf32> to vector<8x32xf32>
    %164 = arith.mulf %159, %163 : vector<8x32xf32>
    %165 = vector.broadcast %145 : vector<1x32xf32> to vector<8x32xf32>
    %166 = arith.mulf %164, %165 : vector<8x32xf32>
    %167 = vector.broadcast %146 : vector<1x32xf32> to vector<8x32xf32>
    %168 = arith.addf %166, %167 : vector<8x32xf32>
    %c0_70 = arith.constant 0 : index
    %c0_71 = arith.constant 0 : index
    %169 = vector.load %arg3[%c0_70, %c0_71] : memref<8x1xi32, #tpu.memory_space<vmem>>, vector<8x1xi32>
    %170 = vector.broadcast %169 : vector<8x1xi32> to vector<8x128xi32>
    %171 = arith.cmpi eq, %1, %170 : vector<8x128xi32>
    %172 = arith.extui %171 : vector<8x128xi1> to vector<8x128xi32>
    %173 = arith.sitofp %172 : vector<8x128xi32> to vector<8x128xf32>
    %174 = arith.truncf %173 : vector<8x128xf32> to vector<8x128xbf16>
    %cst_72 = arith.constant dense<0.000000e+00> : vector<8x32xf32>
    %175 = tpu.matmul %174, %0, %cst_72 {dimension_numbers = #tpu.dot_dimension_numbers<[1], [0], [0], [1], [0, 0, 1, 1], [], []>} : vector<8x128xbf16>, vector<128x32xbf16>, vector<8x32xf32> -> vector<8x32xf32>
    %c32 = arith.constant 32 : index
    %c0_73 = arith.constant 0 : index
    %176 = vector.load %arg8[%c32, %c0_73] : memref<128x128xf32, #tpu.memory_space<vmem>>, vector<8x32xf32>
    %177 = arith.addf %175, %176 : vector<8x32xf32>
    %c70 = arith.constant 70 : index
    %c0_74 = arith.constant 0 : index
    %178 = vector.load %arg8[%c70, %c0_74] : memref<128x128xf32, #tpu.memory_space<vmem>>, vector<1x32xf32>
    %c71 = arith.constant 71 : index
    %c0_75 = arith.constant 0 : index
    %179 = vector.load %arg8[%c71, %c0_75] : memref<128x128xf32, #tpu.memory_space<vmem>>, vector<1x32xf32>
    %cst_76 = arith.constant dense<0.000000e+00> : vector<8xf32>
    %180 = vector.multi_reduction <add>, %177, %cst_76 [1] : vector<8x32xf32> to vector<8xf32>
    %181 = vector.shape_cast %180 : vector<8xf32> to vector<8x1xf32>
    %cst_77 = arith.constant 3.200000e+01 : f32
    %182 = vector.broadcast %cst_77 : f32 to vector<8x1xf32>
    %183 = arith.divf %181, %182 : vector<8x1xf32>
    %184 = vector.broadcast %183 : vector<8x1xf32> to vector<8x32xf32>
    %185 = arith.subf %177, %184 : vector<8x32xf32>
    %186 = arith.mulf %185, %185 : vector<8x32xf32>
    %cst_78 = arith.constant dense<0.000000e+00> : vector<8xf32>
    %187 = vector.multi_reduction <add>, %186, %cst_78 [1] : vector<8x32xf32> to vector<8xf32>
    %188 = vector.shape_cast %187 : vector<8xf32> to vector<8x1xf32>
    %cst_79 = arith.constant 3.200000e+01 : f32
    %189 = vector.broadcast %cst_79 : f32 to vector<8x1xf32>
    %190 = arith.divf %188, %189 : vector<8x1xf32>
    %191 = vector.broadcast %183 : vector<8x1xf32> to vector<8x32xf32>
    %192 = arith.subf %177, %191 : vector<8x32xf32>
    %cst_80 = arith.constant 9.99999974E-6 : f32
    %193 = vector.broadcast %cst_80 : f32 to vector<8x1xf32>
    %194 = arith.addf %190, %193 : vector<8x1xf32>
    %195 = math.rsqrt %194 : vector<8x1xf32>
    %196 = vector.broadcast %195 : vector<8x1xf32> to vector<8x32xf32>
    %197 = arith.mulf %192, %196 : vector<8x32xf32>
    %198 = vector.broadcast %178 : vector<1x32xf32> to vector<8x32xf32>
    %199 = arith.mulf %197, %198 : vector<8x32xf32>
    %200 = vector.broadcast %179 : vector<1x32xf32> to vector<8x32xf32>
    %201 = arith.addf %199, %200 : vector<8x32xf32>
    %202 = arith.truncf %201 : vector<8x32xf32> to vector<8x32xbf16>
    %203 = vector.shape_cast %202 : vector<8x32xbf16> to vector<1x8x32xbf16>
    %204 = vector.shape_cast %203 : vector<1x8x32xbf16> to vector<1x8x32xbf16>
    %205 = vector.broadcast %204 : vector<1x8x32xbf16> to vector<4x8x32xbf16>
    %c3 = arith.constant 3 : index
    %c0_81 = arith.constant 0 : index
    %c0_82 = arith.constant 0 : index
    %c0_83 = arith.constant 0 : index
    %206 = vector.load %arg5[%c3, %c0_81, %c0_82, %c0_83] : memref<12x4x8x32xbf16, #tpu.memory_space<vmem>>, vector<1x4x8x32xbf16>
    %207 = vector.shape_cast %206 : vector<1x4x8x32xbf16> to vector<4x8x32xbf16>
    %c100 = arith.constant 100 : index
    %c0_84 = arith.constant 0 : index
    %208 = vector.load %arg8[%c100, %c0_84] : memref<128x128xf32, #tpu.memory_space<vmem>>, vector<4x8xf32>
    "tpu.trace_start"() <{level = 10 : i32, message = "htd,hed->hte"}> : () -> ()
    %cst_85 = arith.constant dense<0.000000e+00> : vector<4x8x8xf32>
    %209 = tpu.matmul %205, %207, %cst_85 {dimension_numbers = #tpu.dot_dimension_numbers<[2], [2], [1], [1], [0, 0, 0, 1, 1, 1], [0], [0]>} : vector<4x8x32xbf16>, vector<4x8x32xbf16>, vector<4x8x8xf32> -> vector<4x8x8xf32>
    "tpu.trace_stop"() : () -> ()
    %210 = vector.shape_cast %208 : vector<4x8xf32> to vector<4x1x8xf32>
    %211 = vector.broadcast %210 : vector<4x1x8xf32> to vector<4x8x8xf32>
    %212 = arith.addf %209, %211 : vector<4x8x8xf32>
    %c4 = arith.constant 4 : index
    %c0_86 = arith.constant 0 : index
    %c0_87 = arith.constant 0 : index
    %c0_88 = arith.constant 0 : index
    %213 = vector.load %arg5[%c4, %c0_86, %c0_87, %c0_88] : memref<12x4x8x32xbf16, #tpu.memory_space<vmem>>, vector<1x4x8x32xbf16>
    %214 = vector.shape_cast %213 : vector<1x4x8x32xbf16> to vector<4x8x32xbf16>
    %c104 = arith.constant 104 : index
    %c0_89 = arith.constant 0 : index
    %215 = vector.load %arg8[%c104, %c0_89] : memref<128x128xf32, #tpu.memory_space<vmem>>, vector<4x8xf32>
    "tpu.trace_start"() <{level = 10 : i32, message = "htd,hed->hte"}> : () -> ()
    %cst_90 = arith.constant dense<0.000000e+00> : vector<4x8x8xf32>
    %216 = tpu.matmul %205, %214, %cst_90 {dimension_numbers = #tpu.dot_dimension_numbers<[2], [2], [1], [1], [0, 0, 0, 1, 1, 1], [0], [0]>} : vector<4x8x32xbf16>, vector<4x8x32xbf16>, vector<4x8x8xf32> -> vector<4x8x8xf32>
    "tpu.trace_stop"() : () -> ()
    %217 = vector.shape_cast %215 : vector<4x8xf32> to vector<4x1x8xf32>
    %218 = vector.broadcast %217 : vector<4x1x8xf32> to vector<4x8x8xf32>
    %219 = arith.addf %216, %218 : vector<4x8x8xf32>
    %c5 = arith.constant 5 : index
    %c0_91 = arith.constant 0 : index
    %c0_92 = arith.constant 0 : index
    %c0_93 = arith.constant 0 : index
    %220 = vector.load %arg5[%c5, %c0_91, %c0_92, %c0_93] : memref<12x4x8x32xbf16, #tpu.memory_space<vmem>>, vector<1x4x8x32xbf16>
    %221 = vector.shape_cast %220 : vector<1x4x8x32xbf16> to vector<4x8x32xbf16>
    %c108 = arith.constant 108 : index
    %c0_94 = arith.constant 0 : index
    %222 = vector.load %arg8[%c108, %c0_94] : memref<128x128xf32, #tpu.memory_space<vmem>>, vector<4x8xf32>
    "tpu.trace_start"() <{level = 10 : i32, message = "htd,hed->hte"}> : () -> ()
    %cst_95 = arith.constant dense<0.000000e+00> : vector<4x8x8xf32>
    %223 = tpu.matmul %205, %221, %cst_95 {dimension_numbers = #tpu.dot_dimension_numbers<[2], [2], [1], [1], [0, 0, 0, 1, 1, 1], [0], [0]>} : vector<4x8x32xbf16>, vector<4x8x32xbf16>, vector<4x8x8xf32> -> vector<4x8x8xf32>
    "tpu.trace_stop"() : () -> ()
    %224 = vector.shape_cast %222 : vector<4x8xf32> to vector<4x1x8xf32>
    %225 = vector.broadcast %224 : vector<4x1x8xf32> to vector<4x8x8xf32>
    %226 = arith.addf %223, %225 : vector<4x8x8xf32>
    "tpu.trace_start"() <{level = 10 : i32, message = "hqe,hke->hqk"}> : () -> ()
    %cst_96 = arith.constant dense<0.000000e+00> : vector<4x8x8xf32>
    %227 = tpu.matmul %212, %219, %cst_96 {dimension_numbers = #tpu.dot_dimension_numbers<[2], [2], [1], [1], [0, 0, 0, 1, 1, 1], [0], [0]>} : vector<4x8x8xf32>, vector<4x8x8xf32>, vector<4x8x8xf32> -> vector<4x8x8xf32>
    "tpu.trace_stop"() : () -> ()
    %228 = vector.broadcast %13 : vector<1x8x8xf32> to vector<4x8x8xf32>
    %229 = arith.addf %227, %228 : vector<4x8x8xf32>
    %cst_97 = arith.constant dense<0xFF800000> : vector<4x8xf32>
    %230 = vector.multi_reduction <maximumf>, %229, %cst_97 [2] : vector<4x8x8xf32> to vector<4x8xf32>
    %231 = vector.shape_cast %230 : vector<4x8xf32> to vector<4x8x1xf32>
    %232 = vector.broadcast %231 : vector<4x8x1xf32> to vector<4x8x8xf32>
    %233 = arith.subf %229, %232 : vector<4x8x8xf32>
    %234 = math.exp %233 : vector<4x8x8xf32>
    %cst_98 = arith.constant dense<0.000000e+00> : vector<4x8xf32>
    %235 = vector.multi_reduction <add>, %234, %cst_98 [2] : vector<4x8x8xf32> to vector<4x8xf32>
    %236 = vector.shape_cast %235 : vector<4x8xf32> to vector<4x8x1xf32>
    %237 = tpu.reciprocal %236 {approx = true} : vector<4x8x1xf32> -> vector<4x8x1xf32>
    %238 = vector.broadcast %237 : vector<4x8x1xf32> to vector<4x8x8xf32>
    %239 = arith.mulf %234, %238 : vector<4x8x8xf32>
    "tpu.trace_start"() <{level = 10 : i32, message = "hqk,hke->hqe"}> : () -> ()
    %cst_99 = arith.constant dense<0.000000e+00> : vector<4x8x8xf32>
    %240 = tpu.matmul %239, %226, %cst_99 {dimension_numbers = #tpu.dot_dimension_numbers<[2], [1], [1], [2], [0, 0, 0, 1, 1, 2], [0], [0]>} : vector<4x8x8xf32>, vector<4x8x8xf32>, vector<4x8x8xf32> -> vector<4x8x8xf32>
    "tpu.trace_stop"() : () -> ()
    %c10 = arith.constant 10 : index
    %c0_100 = arith.constant 0 : index
    %c0_101 = arith.constant 0 : index
    %c0_102 = arith.constant 0 : index
    %241 = vector.load %arg5[%c10, %c0_100, %c0_101, %c0_102] : memref<12x4x8x32xbf16, #tpu.memory_space<vmem>>, vector<1x4x8x32xbf16>
    %242 = vector.shape_cast %241 : vector<1x4x8x32xbf16> to vector<4x8x32xbf16>
    %243 = arith.truncf %240 : vector<4x8x8xf32> to vector<4x8x8xbf16>
    "tpu.trace_start"() <{level = 10 : i32, message = "hqe,hed->hqd"}> : () -> ()
    %cst_103 = arith.constant dense<0.000000e+00> : vector<4x8x32xf32>
    %244 = tpu.matmul %243, %242, %cst_103 {dimension_numbers = #tpu.dot_dimension_numbers<[2], [1], [1], [2], [0, 0, 0, 1, 1, 2], [0], [0]>} : vector<4x8x8xbf16>, vector<4x8x32xbf16>, vector<4x8x32xf32> -> vector<4x8x32xf32>
    "tpu.trace_stop"() : () -> ()
    %cst_104 = arith.constant dense<0.000000e+00> : vector<8x32xf32>
    %245 = vector.multi_reduction <add>, %244, %cst_104 [0] : vector<4x8x32xf32> to vector<8x32xf32>
    %c79 = arith.constant 79 : index
    %c0_105 = arith.constant 0 : index
    %246 = vector.load %arg8[%c79, %c0_105] : memref<128x128xf32, #tpu.memory_space<vmem>>, vector<1x32xf32>
    %247 = vector.broadcast %246 : vector<1x32xf32> to vector<8x32xf32>
    %248 = arith.addf %245, %247 : vector<8x32xf32>
    %249 = arith.addf %201, %248 : vector<8x32xf32>
    %c72 = arith.constant 72 : index
    %c0_106 = arith.constant 0 : index
    %250 = vector.load %arg8[%c72, %c0_106] : memref<128x128xf32, #tpu.memory_space<vmem>>, vector<1x32xf32>
    %c73 = arith.constant 73 : index
    %c0_107 = arith.constant 0 : index
    %251 = vector.load %arg8[%c73, %c0_107] : memref<128x128xf32, #tpu.memory_space<vmem>>, vector<1x32xf32>
    %cst_108 = arith.constant dense<0.000000e+00> : vector<8xf32>
    %252 = vector.multi_reduction <add>, %249, %cst_108 [1] : vector<8x32xf32> to vector<8xf32>
    %253 = vector.shape_cast %252 : vector<8xf32> to vector<8x1xf32>
    %cst_109 = arith.constant 3.200000e+01 : f32
    %254 = vector.broadcast %cst_109 : f32 to vector<8x1xf32>
    %255 = arith.divf %253, %254 : vector<8x1xf32>
    %256 = vector.broadcast %255 : vector<8x1xf32> to vector<8x32xf32>
    %257 = arith.subf %249, %256 : vector<8x32xf32>
    %258 = arith.mulf %257, %257 : vector<8x32xf32>
    %cst_110 = arith.constant dense<0.000000e+00> : vector<8xf32>
    %259 = vector.multi_reduction <add>, %258, %cst_110 [1] : vector<8x32xf32> to vector<8xf32>
    %260 = vector.shape_cast %259 : vector<8xf32> to vector<8x1xf32>
    %cst_111 = arith.constant 3.200000e+01 : f32
    %261 = vector.broadcast %cst_111 : f32 to vector<8x1xf32>
    %262 = arith.divf %260, %261 : vector<8x1xf32>
    %263 = vector.broadcast %255 : vector<8x1xf32> to vector<8x32xf32>
    %264 = arith.subf %249, %263 : vector<8x32xf32>
    %cst_112 = arith.constant 9.99999974E-6 : f32
    %265 = vector.broadcast %cst_112 : f32 to vector<8x1xf32>
    %266 = arith.addf %262, %265 : vector<8x1xf32>
    %267 = math.rsqrt %266 : vector<8x1xf32>
    %268 = vector.broadcast %267 : vector<8x1xf32> to vector<8x32xf32>
    %269 = arith.mulf %264, %268 : vector<8x32xf32>
    %270 = vector.broadcast %250 : vector<1x32xf32> to vector<8x32xf32>
    %271 = arith.mulf %269, %270 : vector<8x32xf32>
    %272 = vector.broadcast %251 : vector<1x32xf32> to vector<8x32xf32>
    %273 = arith.addf %271, %272 : vector<8x32xf32>
    %274 = arith.truncf %273 : vector<8x32xf32> to vector<8x32xbf16>
    %275 = vector.shape_cast %274 : vector<8x32xbf16> to vector<1x8x32xbf16>
    %276 = vector.shape_cast %275 : vector<1x8x32xbf16> to vector<1x8x32xbf16>
    %277 = vector.broadcast %276 : vector<1x8x32xbf16> to vector<4x8x32xbf16>
    %278 = arith.truncf %168 : vector<8x32xf32> to vector<8x32xbf16>
    %279 = vector.shape_cast %278 : vector<8x32xbf16> to vector<1x8x32xbf16>
    %280 = vector.shape_cast %279 : vector<1x8x32xbf16> to vector<1x8x32xbf16>
    %281 = vector.broadcast %280 : vector<1x8x32xbf16> to vector<4x8x32xbf16>
    %c6 = arith.constant 6 : index
    %c0_113 = arith.constant 0 : index
    %c0_114 = arith.constant 0 : index
    %c0_115 = arith.constant 0 : index
    %282 = vector.load %arg5[%c6, %c0_113, %c0_114, %c0_115] : memref<12x4x8x32xbf16, #tpu.memory_space<vmem>>, vector<1x4x8x32xbf16>
    %283 = vector.shape_cast %282 : vector<1x4x8x32xbf16> to vector<4x8x32xbf16>
    %c112 = arith.constant 112 : index
    %c0_116 = arith.constant 0 : index
    %284 = vector.load %arg8[%c112, %c0_116] : memref<128x128xf32, #tpu.memory_space<vmem>>, vector<4x8xf32>
    "tpu.trace_start"() <{level = 10 : i32, message = "htd,hed->hte"}> : () -> ()
    %cst_117 = arith.constant dense<0.000000e+00> : vector<4x8x8xf32>
    %285 = tpu.matmul %277, %283, %cst_117 {dimension_numbers = #tpu.dot_dimension_numbers<[2], [2], [1], [1], [0, 0, 0, 1, 1, 1], [0], [0]>} : vector<4x8x32xbf16>, vector<4x8x32xbf16>, vector<4x8x8xf32> -> vector<4x8x8xf32>
    "tpu.trace_stop"() : () -> ()
    %286 = vector.shape_cast %284 : vector<4x8xf32> to vector<4x1x8xf32>
    %287 = vector.broadcast %286 : vector<4x1x8xf32> to vector<4x8x8xf32>
    %288 = arith.addf %285, %287 : vector<4x8x8xf32>
    %c7 = arith.constant 7 : index
    %c0_118 = arith.constant 0 : index
    %c0_119 = arith.constant 0 : index
    %c0_120 = arith.constant 0 : index
    %289 = vector.load %arg5[%c7, %c0_118, %c0_119, %c0_120] : memref<12x4x8x32xbf16, #tpu.memory_space<vmem>>, vector<1x4x8x32xbf16>
    %290 = vector.shape_cast %289 : vector<1x4x8x32xbf16> to vector<4x8x32xbf16>
    %c116 = arith.constant 116 : index
    %c0_121 = arith.constant 0 : index
    %291 = vector.load %arg8[%c116, %c0_121] : memref<128x128xf32, #tpu.memory_space<vmem>>, vector<4x8xf32>
    "tpu.trace_start"() <{level = 10 : i32, message = "htd,hed->hte"}> : () -> ()
    %cst_122 = arith.constant dense<0.000000e+00> : vector<4x8x8xf32>
    %292 = tpu.matmul %281, %290, %cst_122 {dimension_numbers = #tpu.dot_dimension_numbers<[2], [2], [1], [1], [0, 0, 0, 1, 1, 1], [0], [0]>} : vector<4x8x32xbf16>, vector<4x8x32xbf16>, vector<4x8x8xf32> -> vector<4x8x8xf32>
    "tpu.trace_stop"() : () -> ()
    %293 = vector.shape_cast %291 : vector<4x8xf32> to vector<4x1x8xf32>
    %294 = vector.broadcast %293 : vector<4x1x8xf32> to vector<4x8x8xf32>
    %295 = arith.addf %292, %294 : vector<4x8x8xf32>
    %c8 = arith.constant 8 : index
    %c0_123 = arith.constant 0 : index
    %c0_124 = arith.constant 0 : index
    %c0_125 = arith.constant 0 : index
    %296 = vector.load %arg5[%c8, %c0_123, %c0_124, %c0_125] : memref<12x4x8x32xbf16, #tpu.memory_space<vmem>>, vector<1x4x8x32xbf16>
    %297 = vector.shape_cast %296 : vector<1x4x8x32xbf16> to vector<4x8x32xbf16>
    %c120 = arith.constant 120 : index
    %c0_126 = arith.constant 0 : index
    %298 = vector.load %arg8[%c120, %c0_126] : memref<128x128xf32, #tpu.memory_space<vmem>>, vector<4x8xf32>
    "tpu.trace_start"() <{level = 10 : i32, message = "htd,hed->hte"}> : () -> ()
    %cst_127 = arith.constant dense<0.000000e+00> : vector<4x8x8xf32>
    %299 = tpu.matmul %281, %297, %cst_127 {dimension_numbers = #tpu.dot_dimension_numbers<[2], [2], [1], [1], [0, 0, 0, 1, 1, 1], [0], [0]>} : vector<4x8x32xbf16>, vector<4x8x32xbf16>, vector<4x8x8xf32> -> vector<4x8x8xf32>
    "tpu.trace_stop"() : () -> ()
    %300 = vector.shape_cast %298 : vector<4x8xf32> to vector<4x1x8xf32>
    %301 = vector.broadcast %300 : vector<4x1x8xf32> to vector<4x8x8xf32>
    %302 = arith.addf %299, %301 : vector<4x8x8xf32>
    "tpu.trace_start"() <{level = 10 : i32, message = "hqe,hke->hqk"}> : () -> ()
    %cst_128 = arith.constant dense<0.000000e+00> : vector<4x8x8xf32>
    %303 = tpu.matmul %288, %295, %cst_128 {dimension_numbers = #tpu.dot_dimension_numbers<[2], [2], [1], [1], [0, 0, 0, 1, 1, 1], [0], [0]>} : vector<4x8x8xf32>, vector<4x8x8xf32>, vector<4x8x8xf32> -> vector<4x8x8xf32>
    "tpu.trace_stop"() : () -> ()
    %304 = vector.broadcast %6 : vector<1x1x8xf32> to vector<4x8x8xf32>
    %305 = arith.addf %303, %304 : vector<4x8x8xf32>
    %cst_129 = arith.constant dense<0xFF800000> : vector<4x8xf32>
    %306 = vector.multi_reduction <maximumf>, %305, %cst_129 [2] : vector<4x8x8xf32> to vector<4x8xf32>
    %307 = vector.shape_cast %306 : vector<4x8xf32> to vector<4x8x1xf32>
    %308 = vector.broadcast %307 : vector<4x8x1xf32> to vector<4x8x8xf32>
    %309 = arith.subf %305, %308 : vector<4x8x8xf32>
    %310 = math.exp %309 : vector<4x8x8xf32>
    %cst_130 = arith.constant dense<0.000000e+00> : vector<4x8xf32>
    %311 = vector.multi_reduction <add>, %310, %cst_130 [2] : vector<4x8x8xf32> to vector<4x8xf32>
    %312 = vector.shape_cast %311 : vector<4x8xf32> to vector<4x8x1xf32>
    %313 = tpu.reciprocal %312 {approx = true} : vector<4x8x1xf32> -> vector<4x8x1xf32>
    %314 = vector.broadcast %313 : vector<4x8x1xf32> to vector<4x8x8xf32>
    %315 = arith.mulf %310, %314 : vector<4x8x8xf32>
    "tpu.trace_start"() <{level = 10 : i32, message = "hqk,hke->hqe"}> : () -> ()
    %cst_131 = arith.constant dense<0.000000e+00> : vector<4x8x8xf32>
    %316 = tpu.matmul %315, %302, %cst_131 {dimension_numbers = #tpu.dot_dimension_numbers<[2], [1], [1], [2], [0, 0, 0, 1, 1, 2], [0], [0]>} : vector<4x8x8xf32>, vector<4x8x8xf32>, vector<4x8x8xf32> -> vector<4x8x8xf32>
    "tpu.trace_stop"() : () -> ()
    %c11 = arith.constant 11 : index
    %c0_132 = arith.constant 0 : index
    %c0_133 = arith.constant 0 : index
    %c0_134 = arith.constant 0 : index
    %317 = vector.load %arg5[%c11, %c0_132, %c0_133, %c0_134] : memref<12x4x8x32xbf16, #tpu.memory_space<vmem>>, vector<1x4x8x32xbf16>
    %318 = vector.shape_cast %317 : vector<1x4x8x32xbf16> to vector<4x8x32xbf16>
    %319 = arith.truncf %316 : vector<4x8x8xf32> to vector<4x8x8xbf16>
    "tpu.trace_start"() <{level = 10 : i32, message = "hqe,hed->hqd"}> : () -> ()
    %cst_135 = arith.constant dense<0.000000e+00> : vector<4x8x32xf32>
    %320 = tpu.matmul %319, %318, %cst_135 {dimension_numbers = #tpu.dot_dimension_numbers<[2], [1], [1], [2], [0, 0, 0, 1, 1, 2], [0], [0]>} : vector<4x8x8xbf16>, vector<4x8x32xbf16>, vector<4x8x32xf32> -> vector<4x8x32xf32>
    "tpu.trace_stop"() : () -> ()
    %cst_136 = arith.constant dense<0.000000e+00> : vector<8x32xf32>
    %321 = vector.multi_reduction <add>, %320, %cst_136 [0] : vector<4x8x32xf32> to vector<8x32xf32>
    %c80 = arith.constant 80 : index
    %c0_137 = arith.constant 0 : index
    %322 = vector.load %arg8[%c80, %c0_137] : memref<128x128xf32, #tpu.memory_space<vmem>>, vector<1x32xf32>
    %323 = vector.broadcast %322 : vector<1x32xf32> to vector<8x32xf32>
    %324 = arith.addf %321, %323 : vector<8x32xf32>
    %325 = arith.addf %273, %324 : vector<8x32xf32>
    %c74 = arith.constant 74 : index
    %c0_138 = arith.constant 0 : index
    %326 = vector.load %arg8[%c74, %c0_138] : memref<128x128xf32, #tpu.memory_space<vmem>>, vector<1x32xf32>
    %c75 = arith.constant 75 : index
    %c0_139 = arith.constant 0 : index
    %327 = vector.load %arg8[%c75, %c0_139] : memref<128x128xf32, #tpu.memory_space<vmem>>, vector<1x32xf32>
    %cst_140 = arith.constant dense<0.000000e+00> : vector<8xf32>
    %328 = vector.multi_reduction <add>, %325, %cst_140 [1] : vector<8x32xf32> to vector<8xf32>
    %329 = vector.shape_cast %328 : vector<8xf32> to vector<8x1xf32>
    %cst_141 = arith.constant 3.200000e+01 : f32
    %330 = vector.broadcast %cst_141 : f32 to vector<8x1xf32>
    %331 = arith.divf %329, %330 : vector<8x1xf32>
    %332 = vector.broadcast %331 : vector<8x1xf32> to vector<8x32xf32>
    %333 = arith.subf %325, %332 : vector<8x32xf32>
    %334 = arith.mulf %333, %333 : vector<8x32xf32>
    %cst_142 = arith.constant dense<0.000000e+00> : vector<8xf32>
    %335 = vector.multi_reduction <add>, %334, %cst_142 [1] : vector<8x32xf32> to vector<8xf32>
    %336 = vector.shape_cast %335 : vector<8xf32> to vector<8x1xf32>
    %cst_143 = arith.constant 3.200000e+01 : f32
    %337 = vector.broadcast %cst_143 : f32 to vector<8x1xf32>
    %338 = arith.divf %336, %337 : vector<8x1xf32>
    %339 = vector.broadcast %331 : vector<8x1xf32> to vector<8x32xf32>
    %340 = arith.subf %325, %339 : vector<8x32xf32>
    %cst_144 = arith.constant 9.99999974E-6 : f32
    %341 = vector.broadcast %cst_144 : f32 to vector<8x1xf32>
    %342 = arith.addf %338, %341 : vector<8x1xf32>
    %343 = math.rsqrt %342 : vector<8x1xf32>
    %344 = vector.broadcast %343 : vector<8x1xf32> to vector<8x32xf32>
    %345 = arith.mulf %340, %344 : vector<8x32xf32>
    %346 = vector.broadcast %326 : vector<1x32xf32> to vector<8x32xf32>
    %347 = arith.mulf %345, %346 : vector<8x32xf32>
    %348 = vector.broadcast %327 : vector<1x32xf32> to vector<8x32xf32>
    %349 = arith.addf %347, %348 : vector<8x32xf32>
    %c32_145 = arith.constant 32 : index
    %c0_146 = arith.constant 0 : index
    %350 = vector.load %arg6[%c32_145, %c0_146] : memref<64x64xbf16, #tpu.memory_space<vmem>>, vector<32x64xbf16>
    %351 = arith.truncf %349 : vector<8x32xf32> to vector<8x32xbf16>
    %cst_147 = arith.constant dense<0.000000e+00> : vector<8x64xf32>
    %352 = tpu.matmul %351, %350, %cst_147 {dimension_numbers = #tpu.dot_dimension_numbers<[1], [0], [0], [1], [0, 0, 1, 1], [], []>} : vector<8x32xbf16>, vector<32x64xbf16>, vector<8x64xf32> -> vector<8x64xf32>
    %c84 = arith.constant 84 : index
    %c0_148 = arith.constant 0 : index
    %353 = vector.load %arg8[%c84, %c0_148] : memref<128x128xf32, #tpu.memory_space<vmem>>, vector<1x64xf32>
    %354 = vector.broadcast %353 : vector<1x64xf32> to vector<8x64xf32>
    %355 = arith.addf %352, %354 : vector<8x64xf32>
    %cst_149 = arith.constant 5.000000e-01 : f32
    %356 = vector.broadcast %cst_149 : f32 to vector<8x64xf32>
    %357 = arith.mulf %356, %355 : vector<8x64xf32>
    %cst_150 = arith.constant 4.471500e-02 : f32
    %358 = vector.broadcast %cst_150 : f32 to vector<8x64xf32>
    %359 = arith.mulf %358, %355 : vector<8x64xf32>
    %360 = arith.mulf %359, %355 : vector<8x64xf32>
    %361 = arith.mulf %360, %355 : vector<8x64xf32>
    %362 = arith.addf %355, %361 : vector<8x64xf32>
    %cst_151 = arith.constant 0.797884583 : f32
    %363 = vector.broadcast %cst_151 : f32 to vector<8x64xf32>
    %364 = arith.mulf %363, %362 : vector<8x64xf32>
    %365 = math.tanh %364 : vector<8x64xf32>
    %cst_152 = arith.constant 1.000000e+00 : f32
    %366 = vector.broadcast %cst_152 : f32 to vector<8x64xf32>
    %367 = arith.addf %366, %365 : vector<8x64xf32>
    %368 = arith.mulf %357, %367 : vector<8x64xf32>
    %c192 = arith.constant 192 : index
    %c0_153 = arith.constant 0 : index
    %369 = vector.load %arg7[%c192, %c0_153] : memref<256x32xbf16, #tpu.memory_space<vmem>>, vector<64x32xbf16>
    %370 = arith.truncf %368 : vector<8x64xf32> to vector<8x64xbf16>
    %cst_154 = arith.constant dense<0.000000e+00> : vector<8x32xf32>
    %371 = tpu.matmul %370, %369, %cst_154 {dimension_numbers = #tpu.dot_dimension_numbers<[1], [0], [0], [1], [0, 0, 1, 1], [], []>} : vector<8x64xbf16>, vector<64x32xbf16>, vector<8x32xf32> -> vector<8x32xf32>
    %c82 = arith.constant 82 : index
    %c0_155 = arith.constant 0 : index
    %372 = vector.load %arg8[%c82, %c0_155] : memref<128x128xf32, #tpu.memory_space<vmem>>, vector<1x32xf32>
    %373 = vector.broadcast %372 : vector<1x32xf32> to vector<8x32xf32>
    %374 = arith.addf %371, %373 : vector<8x32xf32>
    %375 = arith.addf %349, %374 : vector<8x32xf32>
    %c76 = arith.constant 76 : index
    %c0_156 = arith.constant 0 : index
    %376 = vector.load %arg8[%c76, %c0_156] : memref<128x128xf32, #tpu.memory_space<vmem>>, vector<1x32xf32>
    %c77 = arith.constant 77 : index
    %c0_157 = arith.constant 0 : index
    %377 = vector.load %arg8[%c77, %c0_157] : memref<128x128xf32, #tpu.memory_space<vmem>>, vector<1x32xf32>
    %cst_158 = arith.constant dense<0.000000e+00> : vector<8xf32>
    %378 = vector.multi_reduction <add>, %375, %cst_158 [1] : vector<8x32xf32> to vector<8xf32>
    %379 = vector.shape_cast %378 : vector<8xf32> to vector<8x1xf32>
    %cst_159 = arith.constant 3.200000e+01 : f32
    %380 = vector.broadcast %cst_159 : f32 to vector<8x1xf32>
    %381 = arith.divf %379, %380 : vector<8x1xf32>
    %382 = vector.broadcast %381 : vector<8x1xf32> to vector<8x32xf32>
    %383 = arith.subf %375, %382 : vector<8x32xf32>
    %384 = arith.mulf %383, %383 : vector<8x32xf32>
    %cst_160 = arith.constant dense<0.000000e+00> : vector<8xf32>
    %385 = vector.multi_reduction <add>, %384, %cst_160 [1] : vector<8x32xf32> to vector<8xf32>
    %386 = vector.shape_cast %385 : vector<8xf32> to vector<8x1xf32>
    %cst_161 = arith.constant 3.200000e+01 : f32
    %387 = vector.broadcast %cst_161 : f32 to vector<8x1xf32>
    %388 = arith.divf %386, %387 : vector<8x1xf32>
    %389 = vector.broadcast %381 : vector<8x1xf32> to vector<8x32xf32>
    %390 = arith.subf %375, %389 : vector<8x32xf32>
    %cst_162 = arith.constant 9.99999974E-6 : f32
    %391 = vector.broadcast %cst_162 : f32 to vector<8x1xf32>
    %392 = arith.addf %388, %391 : vector<8x1xf32>
    %393 = math.rsqrt %392 : vector<8x1xf32>
    %394 = vector.broadcast %393 : vector<8x1xf32> to vector<8x32xf32>
    %395 = arith.mulf %390, %394 : vector<8x32xf32>
    %396 = vector.broadcast %376 : vector<1x32xf32> to vector<8x32xf32>
    %397 = arith.mulf %395, %396 : vector<8x32xf32>
    %398 = vector.broadcast %377 : vector<1x32xf32> to vector<8x32xf32>
    %399 = arith.addf %397, %398 : vector<8x32xf32>
    %400 = arith.truncf %399 : vector<8x32xf32> to vector<8x32xbf16>
    %cst_163 = arith.constant dense<0.000000e+00> : vector<8x128xf32>
    %401 = tpu.matmul %400, %0, %cst_163 {dimension_numbers = #tpu.dot_dimension_numbers<[1], [1], [0], [0], [0, 0, 1, 0], [], []>} : vector<8x32xbf16>, vector<128x32xbf16>, vector<8x128xf32> -> vector<8x128xf32>
    %c85 = arith.constant 85 : index
    %c0_164 = arith.constant 0 : index
    %402 = vector.load %arg8[%c85, %c0_164] : memref<128x128xf32, #tpu.memory_space<vmem>>, vector<1x128xf32>
    %403 = vector.broadcast %402 : vector<1x128xf32> to vector<8x128xf32>
    %404 = arith.addf %401, %403 : vector<8x128xf32>
    %c0_165 = arith.constant 0 : index
    %c0_166 = arith.constant 0 : index
    %405 = vector.load %arg10[%c0_165, %c0_166] : memref<8x128xf32, #tpu.memory_space<vmem>>, vector<8x128xf32>
    tpu.vector_store %arg10[%c0_165, %c0_166], %404 {strides = array<i32>} : memref<8x128xf32, #tpu.memory_space<vmem>>, vector<8x128xf32>,
    %c0_167 = arith.constant 0 : index
    %c0_168 = arith.constant 0 : index
    %406 = vector.load %arg4[%c0_167, %c0_168] : memref<8x1xi32, #tpu.memory_space<vmem>>, vector<8x1xi32>
    %cst_169 = arith.constant dense<0xFF800000> : vector<8xf32>
    %407 = vector.multi_reduction <maximumf>, %404, %cst_169 [1] : vector<8x128xf32> to vector<8xf32>
    %408 = vector.shape_cast %407 : vector<8xf32> to vector<8x1xf32>
    %409 = vector.broadcast %408 : vector<8x1xf32> to vector<8x128xf32>
    %410 = arith.subf %404, %409 : vector<8x128xf32>
    %411 = math.exp %410 : vector<8x128xf32>
    %cst_170 = arith.constant dense<0.000000e+00> : vector<8xf32>
    %412 = vector.multi_reduction <add>, %411, %cst_170 [1] : vector<8x128xf32> to vector<8xf32>
    %413 = vector.shape_cast %412 : vector<8xf32> to vector<8x1xf32>
    %414 = math.log %413 : vector<8x1xf32>
    %415 = arith.addf %414, %408 : vector<8x1xf32>
    %416 = vector.broadcast %406 : vector<8x1xi32> to vector<8x128xi32>
    %417 = arith.cmpi eq, %1, %416 : vector<8x128xi32>
    %cst_171 = arith.constant 0.000000e+00 : f32
    %418 = vector.broadcast %cst_171 : f32 to vector<8x128xf32>
    %419 = arith.select %417, %404, %418 : vector<8x128xi1>, vector<8x128xf32>
    %cst_172 = arith.constant dense<0.000000e+00> : vector<8xf32>
    %420 = vector.multi_reduction <add>, %419, %cst_172 [1] : vector<8x128xf32> to vector<8xf32>
    %421 = vector.shape_cast %420 : vector<8xf32> to vector<8x1xf32>
    %422 = arith.subf %415, %421 : vector<8x1xf32>
    %423 = vector.shape_cast %422 : vector<8x1xf32> to vector<1x8x1xf32>
    %cst_173 = arith.constant dense<0.000000e+00> : vector<1xf32>
    %424 = vector.multi_reduction <add>, %423, %cst_173 [1, 2] : vector<1x8x1xf32> to vector<1xf32>
    %425 = vector.shape_cast %424 : vector<1xf32> to vector<1x1x1xf32>
    %426 = vector.extract %425[0, 0, 0] : f32 from vector<1x1x1xf32>
    %427 = vector.broadcast %426 : f32 to vector<1x1xf32>
    %428 = vector.shape_cast %427 : vector<1x1xf32> to vector<1x1x1xf32>
    %429 = vector.shape_cast %428 : vector<1x1x1xf32> to vector<1x1x1xf32>
    %430 = vector.broadcast %429 : vector<1x1x1xf32> to vector<1x1x128xf32>
    %c0_174 = arith.constant 0 : index
    %c0_175 = arith.constant 0 : index
    %c0_176 = arith.constant 0 : index
    %431 = vector.load %arg9[%c0_174, %c0_175, %c0_176] : memref<1x1x128xf32, #tpu.memory_space<vmem>>, vector<1x1x128xf32>
    tpu.vector_store %arg9[%c0_174, %c0_175, %c0_176], %430 {strides = array<i32>} : memref<1x1x128xf32, #tpu.memory_space<vmem>>, vector<1x1x128xf32>,
    return
  }
  func.func @transform_0(%arg0: i32) -> (i32, i32) {
    %c0_i32 = arith.constant 0 : i32
    %c0_i32_0 = arith.constant 0 : i32
    return %arg0, %c0_i32 : i32, i32
  }
  func.func @transform_1(%arg0: i32) -> (i32, i32, i32) {
    %c0_i32 = arith.constant 0 : i32
    %c0_i32_0 = arith.constant 0 : i32
    %c0_i32_1 = arith.constant 0 : i32
    return %arg0, %c0_i32, %c0_i32_0 : i32, i32, i32
  }
  func.func @transform_2(%arg0: i32) -> (i32, i32) {
    %c0_i32 = arith.constant 0 : i32
    %c0_i32_0 = arith.constant 0 : i32
    return %arg0, %c0_i32 : i32, i32
  }
  func.func @transform_3(%arg0: i32) -> (i32, i32) {
    %c0_i32 = arith.constant 0 : i32
    %c0_i32_0 = arith.constant 0 : i32
    return %arg0, %c0_i32 : i32, i32
  }
  func.func @transform_4(%arg0: i32) -> (i32, i32, i32, i32) {
    %c0_i32 = arith.constant 0 : i32
    %c0_i32_0 = arith.constant 0 : i32
    %c0_i32_1 = arith.constant 0 : i32
    %c0_i32_2 = arith.constant 0 : i32
    %c0_i32_3 = arith.constant 0 : i32
    return %c0_i32, %c0_i32_0, %c0_i32_1, %c0_i32_2 : i32, i32, i32, i32
  }
  func.func @transform_5(%arg0: i32) -> (i32, i32) {
    %c0_i32 = arith.constant 0 : i32
    %c0_i32_0 = arith.constant 0 : i32
    %c0_i32_1 = arith.constant 0 : i32
    return %c0_i32, %c0_i32_0 : i32, i32
  }
  func.func @transform_6(%arg0: i32) -> (i32, i32) {
    %c0_i32 = arith.constant 0 : i32
    %c0_i32_0 = arith.constant 0 : i32
    %c0_i32_1 = arith.constant 0 : i32
    return %c0_i32, %c0_i32_0 : i32, i32
  }
  func.func @transform_7(%arg0: i32) -> (i32, i32) {
    %c0_i32 = arith.constant 0 : i32
    %c0_i32_0 = arith.constant 0 : i32
    %c0_i32_1 = arith.constant 0 : i32
    return %c0_i32, %c0_i32_0 : i32, i32
  }
  func.func @transform_8(%arg0: i32) -> (i32, i32, i32) {
    %c0_i32 = arith.constant 0 : i32
    %c0_i32_0 = arith.constant 0 : i32
    %c0_i32_1 = arith.constant 0 : i32
    return %arg0, %c0_i32, %c0_i32_0 : i32, i32, i32
  }
  func.func @transform_9(%arg0: i32) -> (i32, i32) {
    %c0_i32 = arith.constant 0 : i32
    %c0_i32_0 = arith.constant 0 : i32
    return %arg0, %c0_i32 : i32, i32
  }
}

</mosaic_0001>

<bundles_post_ra>
// kernel: bart_forward.1
= control target key start
LH: loop header
LB: loop body
LE: loop exit
PB: predicated region body
PF: predicated region fallthrough
CT: control target
= control target key end

     0   :  { %s4230_s0 = inlined_call_operand.vmem [shape: s32[16,1], index: 0, kind: input, shape index: {}]   ;;  %s4231_s1 = inlined_call_operand.vmem [shape: f32[2,1,8], index: 1, kind: input, shape index: {}]   ;;  %s4232_s2 = inlined_call_operand.vmem [shape: s32[16,1], index: 2, kind: input, shape index: {}]   ;;  %s4233_s3 = inlined_call_operand.vmem [shape: s32[16,1], index: 3, kind: input, shape index: {}]   ;;  %s4234_s4 = inlined_call_operand.vmem [shape: bf16[12,4,8,32], index: 4, kind: input, shape index: {}]   ;;  %s4235_s5 = inlined_call_operand.hbm [shape: bf16[64,64], index: 5, kind: input, shape index: {}]   ;;  %s4236_s6 = inlined_call_operand.vmem [shape: bf16[256,32], index: 6, kind: input, shape index: {}]   ;;  %s4237_s7 = inlined_call_operand.hbm [shape: f32[128,128], index: 7, kind: input, shape index: {}]   ;;  %s4238_s8 = inlined_call_operand.vmem [shape: f32[2,1,128], index: 8, kind: output, shape index: {0}]   ;;  %s4239_s9 = inlined_call_operand.hbm [shape: f32[16,128], index: 9, kind: output, shape index: {1}]  }
   0x1   :  { %4240 = sst [smem:[#allocation11_spill]] %s4230_s0 }
   0x2   :  { %4241 = sst [smem:[#allocation12_spill]] %s4231_s1 }
   0x3   :  { %4242 = sst [smem:[#allocation13_spill]] %s4235_s5 }
   0x4   :  { %15 = vsyncpa [#allocation3], 0 }
   0x5   :  { %16 = vsyncpa [#allocation6], 0 }
   0x6   :  { %17 = vsyncpa [#allocation4], 0 }
   0x7   :  { %19 = vsyncpa [#allocation4 + $0x1], 0  ;;  %s3553_s30 = smov 0   ;;  %s3555_s10 = smov 0  }
   0x8   :  { %s3557_s11 = smov 0   ;;  %s3559_s12 = smov 0  }
   0x9 LB: > { %s3574_s13 = sadd.s32 4294967295, %s3491_s12   ;;  %s2931_s14 = sadd.s32 4294967294, %s3491_s12   ;;  %s3491_s12 = sphi %s3559_s12, %s4252_s12   ;;  %s3487_s11 = sphi %s3557_s11, %s4251_s11   ;;  %s3483_s10 = sphi %s3555_s10, %s4250_s10   ;;  %s3479_s30 = sphi %s3553_s30, %s4249_s30  }
   0xa   : > { %s3578_s15 = sadd.s32 1, %s3491_s12   ;;  %s246_s16 = sadd.s32 1, %s3487_s11 }
   0xb   : > { %s243_s17 = ssub.s32 %s3491_s12, %s3578_s15  ;;  %p256_p0 = scmp.ne.s32.totalorder %s3487_s11, %s3483_s10 }
   0xc   : > { %p244_p1 = scmp.eq.s32.totalorder %s243_s17, 0  ;;  %p257_p2 = scmp.eq.s32.totalorder %s3574_s13, 1 }
   0xd   : > { %p262_p3 = scmp.ne.s32.totalorder %s3483_s10, %s3479_s30  ;;  %p263_p4 = scmp.eq.s32.totalorder %s2931_s14, 1 }
   0xe   : > { %s3589_s18 = scalar_select %p244_p1, %s3487_s11, %s246_s16  }
   0xf   : > { %p3591_p5 = por %p257_p2, %p256_p0  ;;  %p3595_p6 = por %p263_p4, %p262_p3 }
  0x10   : > { %p2932_p7 = scmp.ge.s32.totalorder %s3491_s12, 1  ;;  %p270_p8 = scmp.lt.s32.totalorder %s3491_s12, 3 }
  0x11   : > { %p3209_p9 = scmp.eq.s32.totalorder %s3574_s13, 0  ;;  %s4246_s5 = sld [smem:[#allocation13_spill]] }
  0x12   : > { %p3602_p10 = pnand %p2932_p7, %p270_p8  ;;  %s3493_s25 = smov [#allocation2]  }
  0x13   : > { %s286_s26 = sshll.u32 %s3493_s25, 4  ;;  %s301_s29 = sshll.u32 %s4237_s7, 4  ;;  %s287_s26 = int_to_ptr.vmem [resolvable:$true] %s286_s26  ;;  %s302_s29 = int_to_ptr.hbm [resolvable:$true] %s301_s29 }
  0x14   : > { %p3198_p11 = pneg %p3602_p10  ;;  %s3494_s14 = smov 64  }
  0x15   : > { %s3495_s16 = smov 4   ;;  %s3496_s17 = smov [#allocation5]  }
  0x16   : > { %p3199_p12 = pnand %p3209_p9, %p3198_p11  ;;  %s303_s22 = sshll.u32 %s3496_s17, 4  ;;  %s304_s22 = int_to_ptr.vmem [resolvable:$true] %s303_s22 }
  0x17   : > { %s284_s24 = sshll.u32 %s4246_s5, 4  ;;  %s3497_s23 = smov 128   ;;  %s285_s24 = int_to_ptr.hbm [resolvable:$true] %s284_s24 }
  0x18   : > { %3201 = dma.hbm_to_vmem [thread:$0]  (!%p3199_p12), %s285_s24, 512, %s287_s26, [#allocation3], %s3494_s14, %s3494_s14, %s3495_s16  }
  0x19   : > { %s3498_s5 = smov 8   ;;  %346 = sbr.rel (%p3602_p10) target bundleno = 5123 (0x1403), region = 52 }
  0x1a   : > { %3204 = dma.hbm_to_vmem [thread:$0]  (!%p3199_p12), %s302_s29, 2048, %s304_s22, [#allocation6], %s3497_s23, %s3497_s23, %s3498_s5  }
  0x1e   : > { %3466 = dma.done.wait (%p3209_p9), [#allocation3], 512  }
  0x1f   : > { %3468 = vsyncadd (%p3209_p9), [#allocation3], 4294966784 }
  0x20   : > { %3470 = dma.done.wait (%p3209_p9), [#allocation6], 2048  }
  0x21   : > { %3472 = vsyncadd (%p3209_p9), [#allocation6], 4294965248  ;;  %p401_p13 = scmp.lt.s32.totalorder %s3574_s13, 1  ;;  %v3499_v0 = vmov 0   ;;  %s4247_s0 = sld [smem:[#allocation11_spill]]  ;;  %v3640_v2 = vld [vmem:[%s4236_s6 + $0x38] sm:$0xff]  ;;  %v436_v10 = vlaneseq }
  0x22   : > { %3256 = vset.pattern.permute.xlu0 %v3499_v0  ;;  %3257 = vset.pattern.permute.xlu2 %v3499_v0  ;;  %v3646_v3 = vld [vmem:[%s4236_s6 + $0x30] sm:$0xff]  ;;  %v3651_v4 = vld [vmem:[%s4236_s6 + $0x28] sm:$0xff]  ;;  %v3657_v5 = vld [vmem:[%s4236_s6 + $0x20] sm:$0xff]  ;;  %v3500_v13 = vmov 1.0|1.0   ;;  %vm517_vm2 = vcmask 261120  }
  0x23   : > { %s3628_s5 = scalar_select %p401_p13, %s3574_s13, 1  ;;  %3258 = vset.pattern.permute.xlu1 %v3499_v0  ;;  %502 = vmatpush.bf16.msra.mxu0 %v3640_v2  ;;  %v3664_v6 = vld [vmem:[%s4236_s6 + $0x18] sm:$0xff]  ;;  %v3670_v7 = vld [vmem:[%s4236_s6 + $0x10] sm:$0xff]  ;;  %v3676_v8 = vld [vmem:[%s4236_s6 + $0x8] sm:$0xff]  ;;  %v3686_v11 = vand.u32 127, %v436_v10  ;;  %v3501_v19 = vmov 32.0  }
  0x24   : > { %v3682_v9 = vld [vmem:[%s4236_s6] sm:$0xff]  ;;  %3281 = vrcp.f32 %v3501_v19  ;;  %v554_v33 = vld [vmem:[%s4234_s4 + $0x8] sm:$0xf]  ;;  %v555_v38 = vld [vmem:[%s4234_s4 + $0xc] sm:$0xf]  ;;  %vm803_vm7 = vcmask 64512  }
  0x25   : > { %s3631_s21 = sshll.u32 %s3628_s5, 3  ;;  %v453_v14 = vld [vmem:[#allocation5] sm:$0xff]  ;;  %v605_v36 = vsel %vm517_vm2, %v554_v33, 0  ;;  %v2982_v39 = vld [vmem:[%s4234_s4 + $0x10] sm:$0xf]  ;;  %v621_v42 = vsel %vm517_vm2, %v555_v38, 0 }
  0x26   : > { %v552_v31 = vld [vmem:[%s4234_s4] sm:$0xf]  ;;  %v553_v32 = vld [vmem:[%s4234_s4 + $0x4] sm:$0xf]  ;;  %614 = vmatpush.bf16.xpose.msra.mxu3 %v605_v36  ;;  %v2983_v40 = vld [vmem:[%s4234_s4 + $0x14] sm:$0xf]  ;;  %s411_s28 = scalar_lea.vmem %s4232_s2, %s3631_s21 }
  0x27   : > { %s404_s26 = scalar_lea.vmem %s4247_s0, %s3631_s21  ;;  %503 = vmatpush.bf16.msra.mxu0 %v3646_v3  ;;  %v573_v34 = vsel %vm517_vm2, %v552_v31, 0  ;;  %v589_v35 = vsel %vm517_vm2, %v553_v32, 0  ;;  %v655_v43 = vsel %vm517_vm2, %v2982_v39, 0  ;;  %v671_v44 = vsel %vm517_vm2, %v2983_v40, 0  ;;  %v3259_v52 = vld [vmem:[#allocation5 + $0x40] ss:$0 sm:$0xff] }
  0x28   : > { %v445_v1 = vld [vmem:[%s404_s26] sm:$0xff]  ;;  %582 = vmatpush.bf16.xpose.msra.mxu1 %v573_v34  ;;  %598 = vmatpush.bf16.xpose.msra.mxu2 %v589_v35  ;;  %v2984_v57 = vld [vmem:[%s4234_s4 + $0x18] sm:$0xf]  ;;  %v2985_v59 = vld [vmem:[%s4234_s4 + $0x1c] sm:$0xf]  ;;  %s4248_s1 = sld [smem:[#allocation12_spill]] }
  0x29   : > { %447 = vperm.xlu0 %3256, %v445_v1   ;;  %v3260_v54 = vld [vmem:[#allocation5 + $0x41] ss:$0 sm:$0xff]  ;;  %v687_v62 = vsel %vm517_vm2, %v2984_v57, 0  ;;  %v703_v63 = vsel %vm517_vm2, %v2985_v59, 0  ;;  %v2991_v1 = vld [vmem:[%s4234_s4 + $0x24] sm:$0xf] }
  0x2a   : > { %v3282_v20 = vpop.eup %3281  ;;  %v2990_v60 = vld [vmem:[%s4234_s4 + $0x20] sm:$0xf]  ;;  %vm1056_vm8 = vcmask 1043456  }
  0x2b   : > { %504 = vmatpush.bf16.msra.mxu0 %v3651_v4  ;;  %v522_v21 = vmul.f32 32.0, %v3282_v20  ;;  %vm526_vm3 = vweird.f32 %v3282_v20  ;;  %v737_v0 = vsel %vm517_vm2, %v2990_v60, 0 }
  0x2d   : > { %v523_v22 = vsub.f32 1.0, %v522_v21 }
  0x2e   : > { %680 = vmatpush.bf16.xpose.msrb.mxu3 %v671_v44  ;;  %s407_s25 = scalar_lea.vmem %s4248_s1, %s3628_s5 }
  0x2f   : > { %505 = vmatpush.bf16.msra.mxu0 %v3657_v5  ;;  %v524_v23 = vmul.f32 %v3282_v20, %v523_v22  ;;  %v641_v22 = vld [vmem:[#allocation5 + $0x5c] sm:$0xf] }
  0x30   : > { %630 = vmatpush.bf16.xpose.msrb.mxu1 %v621_v42  ;;  %664 = vmatpush.bf16.xpose.msrb.mxu2 %v655_v43  ;;  %v644_v39 = vrot.slane %v641_v22, 2 }
  0x31   : > { %v525_v24 = vadd.f32 %v3282_v20, %v524_v23 }
  0x32   : > { %v648_v43 = vperm.slane %v644_v39, 0 }
  0x33   : > { %506 = vmatpush.bf16.msra.mxu0 %v3664_v6  ;;  %v3691_v25 = vsel %vm526_vm3, %v3282_v20, %v525_v24 }
  0x37   : > { %507 = vmatpush.bf16.msra.mxu0 %v3670_v7 }
  0x3b   : > { %508 = vmatpush.bf16.msra.mxu0 %v3676_v8 }
  0x3f   : > { %509 = vmatpush.bf16.msra.mxu0 %v3682_v9 }
  0x9b   : > { %v448_v12 = vpop.permute.xlu0 %447 }
  0x9c   : > { %vm449_vm0 = vcmp.eq.s32.totalorder %v3686_v11, %v448_v12  ;;  %v2993_v12 = vld [vmem:[%s4234_s4 + $0x2c] sm:$0xf] }
  0x9d   : > { %vm2976_vm1 = vmpackc.low %vm449_vm0, %vm449_vm0 }
  0x9e   : > { %2977 = vmatmul.msk.bf16.vlgmr.msra.gmra.mxu0 %vm2976_vm1, %v3500_v13  ;;  %vm1248_vm1 = vcmask 523264  }
 0x11b   : > { %v511_v15 = vpop.f32.mrf.mxu0 }
 0x11c   : > { %v512_v16 = vadd.f32 %v511_v15, %v453_v14  ;;  %v753_v14 = vsel %vm517_vm2, %v2991_v1, 0  ;;  %v785_v15 = vsel %vm517_vm2, %v2993_v12, 0 }
 0x11e   : > { %v518_v17 = vsel %vm517_vm2, %v512_v16, 0.0 }
 0x11f   : > { %519 = vadd.xlane.f32.xlu0 %v518_v17 }
 0x123   : > { %v513_v18 = vpop.f32.mrf.mxu0 }
 0x192   : > { %v520_v26 = vpop.xlane.xlu0 %519 }
 0x193   : > { %v528_v27 = vmul.f32 %v3691_v25, %v520_v26 }
 0x195   : > { %v529_v28 = vsub.f32 %v512_v16, %v528_v27  ;;  %v2992_v16 = vld [vmem:[%s4234_s4 + $0x28] sm:$0xf]  ;;  %v643_v27 = vrot.slane %v641_v22, 1 }
 0x196   : > { %v769_v17 = vsel %vm517_vm2, %v2992_v16, 0 }
 0x197   : > { %v530_v29 = vmul.f32 %v529_v28, %v529_v28  ;;  %v647_v31 = vperm.slane %v643_v27, 0 }
 0x199   : > { %v531_v30 = vsel %vm517_vm2, %v530_v29, 0.0 }
 0x19a   : > { %532 = vadd.xlane.f32.xlu1 %v531_v30  ;;  %v646_v30 = vperm.slane %v641_v22, 0 }
 0x20d   : > { %v533_v37 = vpop.xlane.xlu1 %532 }
 0x20e   : > { %v534_v41 = vmul.f32 %v533_v37, %v3691_v25 }
 0x210   : > { %v535_v45 = vadd.f32 1e-05, %v534_v41 }
 0x212   : > { %3283 = vrsqrt.f32 %v535_v45  ;;  %vm542_vm5 = vweird.f32 %v535_v45 }
 0x218   : > { %v3284_v46 = vpop.eup %3283 }
 0x219   : > { %v537_v47 = vmul.f32 %v3284_v46, %v535_v45  ;;  %vm543_vm4 = vweird.f32 %v3284_v46 }
 0x21a   : > { %vm544_vm6 = vmor %vm542_vm5, %vm543_vm4 }
 0x21b   : > { %v538_v48 = vmul.f32 %v3284_v46, %v537_v47 }
 0x21d   : > { %v539_v49 = vmul.f32 0.5, %v538_v48 }
 0x21f   : > { %v540_v50 = vsub.f32 1.5, %v539_v49 }
 0x221   : > { %v541_v51 = vmul.f32 %v3284_v46, %v540_v50  ;;  %v723_v50 = vld [vmem:[#allocation5 + $0x60] sm:$0xf] }
 0x223   : > { %v545_v53 = vsel %vm544_vm6, %v3284_v46, %v541_v51  ;;  %v645_v46 = vrot.slane %v641_v22, 3 }
 0x224   : > { %v546_v55 = vmul.f32 %v545_v53, %v529_v28  ;;  %v556_v28 = vld [vmem:[#allocation5 + $0x58] sm:$0xf] }
 0x225   : > { %v558_v29 = vrot.slane %v556_v28, 1  ;;  %v561_v32 = vperm.slane %v556_v28, 0  ;;  %v559_v42 = vrot.slane %v556_v28, 2  ;;  %v560_v51 = vrot.slane %v556_v28, 3  ;;  %v438_v28 = vld [vmem:[%s407_s25] sm:$0x1]  ;;  %s415_s25 = scalar_lea.vmem %s4233_s3, %s3631_s21 }
 0x226   : > { %v548_v56 = vmul.f32 %v3259_v52, %v546_v55  ;;  %v649_v52 = vperm.slane %v645_v46, 0  ;;  %s398_s21 = sand.u32 1, %s3483_s10  }
 0x227   : > { %v562_v34 = vperm.slane %v558_v29, 0  ;;  %v563_v47 = vperm.slane %v559_v42, 0  ;;  %v564_v55 = vperm.slane %v560_v51, 0  ;;  %v439_v29 = vsub.f32 1.0, %v438_v28  ;;  %v3013_v28 = vld [vmem:[%s4234_s4 + $0x9c] sm:$0xf] }
 0x228   : > { %v3723_v58 = vadd.f32 %v3260_v54, %v548_v56  ;;  %v728_v54 = vperm.slane %v723_v50, 0  ;;  %s4189_s26 = sshll.u32 %s398_s21, 3  ;;  %s2780_s23 = scalar_lea.sflag [#allocation4], %s398_s21 }
 0x229   : > { %s400_s27 = scalar_lea.vmem [#allocation7], %s4189_s26 }
 0x22a   : > { %v551_v61 = vpack.c.bf16 %v3723_v58, %v3723_v58  ;;  %s2795_s17 = sshll.u32 %s400_s27, 4  ;;  %s2796_s17 = int_to_ptr.vmem [resolvable:$true] %s2795_s17 }
 0x22c   : > { %2978 = vmatmul.msk.bf16.vlgmr.msra.gmra.mxu1 %vm517_vm2, %v551_v61  ;;  %2979 = vmatmul.msk.bf16.vlgmr.msra.gmra.mxu2 %vm517_vm2, %v551_v61 }
 0x22d   : > { %2980 = vmatmul.msk.bf16.vlgmr.msra.gmra.mxu3 %vm517_vm2, %v551_v61  ;;  %696 = vmatpush.bf16.xpose.msra.mxu1 %v687_v62  ;;  %v725_v62 = vrot.slane %v723_v50, 1 }
 0x22e   : > { %712 = vmatpush.bf16.xpose.msra.mxu2 %v703_v63  ;;  %746 = vmatpush.bf16.xpose.msra.mxu3 %v737_v0 }
 0x22f   : > { %v729_v0 = vperm.slane %v725_v62, 0 }
 0x23c   : > { %2981 = vmatmul.msk.bf16.vlgmr.msrb.gmra.mxu1 %vm517_vm2, %v551_v61  ;;  %2986 = vmatmul.msk.bf16.vlgmr.msrb.gmra.mxu2 %vm517_vm2, %v551_v61 }
 0x23d   : > { %2987 = vmatmul.msk.bf16.vlgmr.msrb.gmra.mxu3 %vm517_vm2, %v551_v61  ;;  %762 = vmatpush.bf16.xpose.msrb.mxu1 %v753_v14  ;;  %v727_v14 = vrot.slane %v723_v50, 3 }
 0x23e   : > { %794 = vmatpush.bf16.xpose.msrb.mxu2 %v785_v15 }
 0x24c   : > { %2988 = vmatmul.msk.bf16.vlgmr.msra.gmra.mxu1 %vm517_vm2, %v551_v61  ;;  %2989 = vmatmul.msk.bf16.vlgmr.msra.gmra.mxu2 %vm517_vm2, %v551_v61 }
 0x24d   : > { %2994 = vmatmul.msk.bf16.vlgmr.msra.gmra.mxu3 %vm517_vm2, %v551_v61  ;;  %778 = vmatpush.bf16.xpose.msra.mxu1 %v769_v17  ;;  %v731_v17 = vperm.slane %v727_v14, 0 }
 0x25c   : > { %2995 = vmatmul.msk.bf16.vlgmr.msrb.gmra.mxu1 %vm517_vm2, %v551_v61  ;;  %2997 = vmatmul.msk.bf16.vlgmr.msrb.gmra.mxu2 %vm517_vm2, %v551_v61 }
 0x26c   : > { %2996 = vmatmul.msk.bf16.vlgmr.msra.gmra.mxu1 %vm517_vm2, %v551_v61 }
 0x2a9   : > { %v584_v18 = vpop.f32.mrf.mxu1 }
 0x2aa   : > { %v585_v40 = vadd.f32 %v584_v18, %v561_v32 }
 0x2af   : > { %v600_v19 = vpop.f32.mrf.mxu2 }
 0x2b0   : > { %v616_v20 = vpop.f32.mrf.mxu3  ;;  %v601_v41 = vadd.f32 %v600_v19, %v562_v34 }
 0x2b1   : > { %v586_v21 = vpop.f32.mrf.mxu1  ;;  %v617_v53 = vadd.f32 %v616_v20, %v563_v47 }
 0x2b2   : > { %v726_v21 = vrot.slane %v723_v50, 2 }
 0x2b4   : > { %v730_v22 = vperm.slane %v726_v21, 0 }
 0x2b7   : > { %v602_v23 = vpop.f32.mrf.mxu2 }
 0x2b8   : > { %v618_v24 = vpop.f32.mrf.mxu3 }
 0x2b9   : > { %v632_v26 = vpop.f32.mrf.mxu1 }
 0x2ba   : > { %v633_v63 = vadd.f32 %v632_v26, %v564_v55 }
 0x2bf   : > { %v666_v33 = vpop.f32.mrf.mxu2 }
 0x2c0   : > { %v667_v35 = vadd.f32 %v666_v33, %v646_v30  ;;  %v682_v36 = vpop.f32.mrf.mxu3  ;;  %v440_v30 = vmul.f32 -1e+09, %v439_v29  ;;  %v1115_v29 = vsel %vm1056_vm8, %v3013_v28, 0 }
 0x2c1   : > { %v683_v37 = vadd.f32 %v682_v36, %v647_v31  ;;  %v634_v38 = vpop.f32.mrf.mxu1 }
 0x2c2   : > { %2998 = vmatpush.xpose.msk.msrb.mxu3 %vm803_vm7, %v667_v35  ;;  %v3772_v31 = vperm.slane %v440_v30, 0  ;;  %v3011_v30 = vld [vmem:[%s4234_s4 + $0x94] sm:$0xf] }
 0x2c3   : > { %3000 = vmatpush.xpose.msk.msrb.mxu0 %vm803_vm7, %v683_v37 }
 0x2c5   : > { %2999 = vmatmul.msk.f32.vlgmr.msrb.gmra.mxu3 %vm803_vm7, %v585_v40 }
 0x2c6   : > { %3001 = vmatmul.msk.f32.vlgmr.msrb.gmra.mxu0 %vm803_vm7, %v601_v41 }
 0x2c7   : > { %v668_v44 = vpop.f32.mrf.mxu2 }
 0x2c8   : > { %v684_v45 = vpop.f32.mrf.mxu3 }
 0x2c9   : > { %v698_v48 = vpop.f32.mrf.mxu1 }
 0x2ca   : > { %v699_v49 = vadd.f32 %v698_v48, %v648_v43 }
 0x2cc   : > { %3002 = vmatpush.xpose.msk.msra.mxu3 %vm803_vm7, %v699_v49 }
 0x2cf   : > { %v714_v56 = vpop.f32.mrf.mxu2  ;;  %3003 = vmatmul.msk.f32.vlgmr.msra.gmra.mxu3 %vm803_vm7, %v617_v53 }
 0x2d0   : > { %v715_v57 = vadd.f32 %v714_v56, %v649_v52  ;;  %v748_v59 = vpop.f32.mrf.mxu3 }
 0x2d1   : > { %v749_v60 = vadd.f32 %v748_v59, %v728_v54  ;;  %v700_v61 = vpop.f32.mrf.mxu1 }
 0x2d2   : > { %3004 = vmatpush.xpose.msk.msra.mxu0 %vm803_vm7, %v715_v57 }
 0x2d3   : > { %970 = vmatpush.msra.mxu2 %v749_v60 }
 0x2d5   : > { %3005 = vmatmul.msk.f32.vlgmr.msra.gmra.mxu0 %vm803_vm7, %v633_v63 }
 0x2d7   : > { %v716_v1 = vpop.f32.mrf.mxu2 }
 0x2d8   : > { %v750_v12 = vpop.f32.mrf.mxu3  ;;  %v1294_v1 = vld [vmem:[%s411_s28] sm:$0xff]  ;;  %s3163_s28 = sshll.u32 %s3574_s13, 3  ;;  %s3441_s13 = scalar_lea.hbm %s4239_s9, 16 }
 0x2d9   : > { %v764_v15 = vpop.f32.mrf.mxu1  ;;  %s2793_s16 = scalar_lea.hbm %s4239_s9, %s3163_s28 }
 0x2da   : > { %v765_v16 = vadd.f32 %v764_v15, %v729_v0  ;;  %s2797_s22 = sshll.u32 %s2793_s16, 4  ;;  %s2798_s22 = int_to_ptr.hbm [resolvable:$true] %s2797_s22 }
 0x2db   : > { %s3435_s24 = sshra.s32 %s2798_s22, 4  ;;  %s3436_s24 = int_to_ptr.hbm [resolvable:$true] %s3435_s24 }
 0x2dc   : > { %993 = vmatpush.msrb.mxu2 %v765_v16  ;;  %p3442_p3 = scmp.lt.s32.totalorder %s3436_s24, %s4239_s9 }
 0x2df   : > { %v796_v18 = vpop.f32.mrf.mxu2 }
 0x2e0   : > { %v797_v19 = vadd.f32 %v796_v18, %v731_v17 }
 0x2e1   : > { %v766_v20 = vpop.f32.mrf.mxu1 }
 0x2e2   : > { %1039 = vmatpush.msrb.mxu0 %v797_v19 }
 0x2e4   : > { %1124 = vmatpush.bf16.msra.mxu0 %v1115_v29 }
 0x2e7   : > { %v798_v23 = vpop.f32.mrf.mxu2 }
 0x2e9   : > { %v780_v24 = vpop.f32.mrf.mxu1 }
 0x2ea   : > { %v781_v26 = vadd.f32 %v780_v24, %v730_v22 }
 0x2ec   : > { %1016 = vmatpush.msrb.mxu3 %v781_v26  ;;  %v3010_v26 = vld [vmem:[%s4234_s4 + $0x90] sm:$0xf] }
 0x2f1   : > { %v782_v27 = vpop.f32.mrf.mxu1 }
 0x2f2   : > { %v1058_v27 = vsel %vm1056_vm8, %v3010_v26, 0  ;;  %v3048_v26 = vld [vmem:[%s4234_s4 + $0x34] sm:$0xf] }
 0x2f3   : > { %1067 = vmatpush.bf16.msrb.mxu1 %v1058_v27  ;;  %v1383_v28 = vsel %vm517_vm2, %v3048_v26, 0 }
 0x343   : > { %v853_v32 = vpop.f32.mrf.mxu0 }
 0x344   : > { %v854_v33 = vadd.f32 %v853_v32, %v3772_v31  ;;  %v1077_v32 = vsel %vm1056_vm8, %v3011_v30, 0 }
 0x346   : > { %v911_v34 = vsel %vm803_vm7, %v854_v33, -inf }
 0x347   : > { %912 = vmax.xlane.f32.xlu2 %v911_v34 }
 0x348   : > { %v827_v35 = vpop.f32.mrf.mxu3 }
 0x349   : > { %v828_v36 = vadd.f32 %v827_v35, %v3772_v31 }
 0x34b   : > { %v908_v37 = vsel %vm803_vm7, %v828_v36, -inf }
 0x34c   : > { %909 = vmax.xlane.f32.xlu1 %v908_v37 }
 0x352   : > { %v879_v38 = vpop.f32.mrf.mxu3  ;;  %v905_v39 = vpop.f32.mrf.mxu0 }
 0x353   : > { %v880_v40 = vadd.f32 %v879_v38, %v3772_v31  ;;  %v906_v41 = vadd.f32 %v905_v39, %v3772_v31 }
 0x355   : > { %v914_v42 = vsel %vm803_vm7, %v880_v40, -inf  ;;  %v917_v43 = vsel %vm803_vm7, %v906_v41, -inf }
 0x356   : > { %915 = vmax.xlane.f32.xlu2 %v914_v42  ;;  %918 = vmax.xlane.f32.xlu1 %v917_v43 }
 0x3ba   : > { %v913_v44 = vpop.xlane.xlu2 %912 }
 0x3bb   : > { %v921_v45 = vsub.f32 %v854_v33, %v913_v44  ;;  %v3012_v33 = vld [vmem:[%s4234_s4 + $0x98] sm:$0xf] }
 0x3bc   : > { %v1096_v34 = vsel %vm1056_vm8, %v3012_v33, 0 }
 0x3bd   : > { %v926_v46 = vmul.f32 1.442695, %v921_v45  ;;  %1105 = vmatpush.bf16.msra.mxu3 %v1096_v34 }
 0x3bf   : > { %3285 = vpow2.f32 %v926_v46  ;;  %v910_v47 = vpop.xlane.xlu1 %909 }
 0x3c0   : > { %v920_v48 = vsub.f32 %v828_v36, %v910_v47  ;;  %v3261_v47 = vld [vmem:[#allocation5 + $0x4e] ss:$0 sm:$0xff] }
 0x3c2   : > { %v924_v49 = vmul.f32 1.442695, %v920_v48 }
 0x3c4   : > { %3287 = vpow2.f32 %v924_v49  ;;  %v1302_v49 = vld [vmem:[#allocation5 + $0x20] sm:$0xff] }
 0x3c5   : > { %v3286_v50 = vpop.eup %3285 }
 0x3c6   : > { %v935_v51 = vsel %vm803_vm7, %v3286_v50, 0.0 }
 0x3c7   : > { %936 = vadd.xlane.f32.xlu1 %v935_v51 }
 0x3c9   : > { %v916_v52 = vpop.xlane.xlu2 %915  ;;  %v919_v53 = vpop.xlane.xlu1 %918 }
 0x3ca   : > { %v3288_v54 = vpop.eup %3287  ;;  %v922_v55 = vsub.f32 %v880_v40, %v916_v52  ;;  %v923_v56 = vsub.f32 %v906_v41, %v919_v53 }
 0x3cb   : > { %v932_v57 = vsel %vm803_vm7, %v3288_v54, 0.0 }
 0x3cc   : > { %v928_v59 = vmul.f32 1.442695, %v922_v55  ;;  %v930_v60 = vmul.f32 1.442695, %v923_v56  ;;  %933 = vadd.xlane.f32.xlu2 %v932_v57 }
 0x3ce   : > { %3289 = vpow2.f32 %v928_v59 }
 0x3cf   : > { %3291 = vpow2.f32 %v930_v60 }
 0x3d4   : > { %v3290_v61 = vpop.eup %3289 }
 0x3d5   : > { %v3292_v62 = vpop.eup %3291  ;;  %v938_v63 = vsel %vm803_vm7, %v3290_v61, 0.0 }
 0x3d6   : > { %939 = vadd.xlane.f32.xlu2 %v938_v63  ;;  %v941_v0 = vsel %vm803_vm7, %v3292_v62, 0.0 }
 0x3d7   : > { %942 = vadd.xlane.f32.xlu1 %v941_v0 }
 0x3ee   : > { %1296 = vperm.xlu2 %3257, %v1294_v1  }
 0x43a   : > { %v937_v14 = vpop.xlane.xlu1 %936 }
 0x43f   : > { %v934_v12 = vpop.xlane.xlu2 %933 }
 0x440   : > { %3293 = vrcp.f32 %v934_v12 }
 0x441   : > { %3295 = vrcp.f32 %v937_v14 }
 0x446   : > { %v3294_v15 = vpop.eup %3293 }
 0x447   : > { %v948_v16 = vmul.f32 %v3294_v15, %v3288_v54  ;;  %v3296_v19 = vpop.eup %3295 }
 0x448   : > { %v949_v20 = vmul.f32 %v3296_v19, %v3286_v50  ;;  %v3057_v19 = vld [vmem:[%s4234_s4 + $0x48] sm:$0xf] }
 0x449   : > { %3006 = vmatmul.msk.f32.vlgmr.msra.gmra.mxu2 %vm803_vm7, %v948_v16  ;;  %v940_v17 = vpop.xlane.xlu2 %939  ;;  %v3175_v16 = vld [vmem:[#allocation2 + $0x8] sm:$0xff] }
 0x44a   : > { %3297 = vrcp.f32 %v940_v17  ;;  %v943_v18 = vpop.xlane.xlu1 %942  ;;  %1086 = vmatpush.bf16.msra.mxu2 %v1077_v32  ;;  %1197 = vmatpush.bf16.msra.mxu1 %v3175_v16  ;;  %v3174_v17 = vld [vmem:[#allocation2] sm:$0xff] }
 0x44b   : > { %3299 = vrcp.f32 %v943_v18  ;;  %v3047_v18 = vld [vmem:[%s4234_s4 + $0x30] sm:$0xf] }
 0x44e   : > { %1198 = vmatpush.bf16.msra.mxu1 %v3174_v17 }
 0x450   : > { %v3298_v21 = vpop.eup %3297 }
 0x451   : > { %v3300_v22 = vpop.eup %3299  ;;  %v950_v23 = vmul.f32 %v3298_v21, %v3290_v61  ;;  %3007 = vmatmul.msk.f32.vlgmr.msrb.gmra.mxu2 %vm803_vm7, %v949_v20  ;;  %v1367_v21 = vsel %vm517_vm2, %v3047_v18, 0  ;;  %v3923_v18 = vld [vmem:[#allocation5 + $0x68] sm:$0xf] }
 0x452   : > { %v951_v24 = vmul.f32 %v3300_v22, %v3292_v62  ;;  %v1481_v22 = vsel %vm517_vm2, %v3057_v19, 0 }
 0x453   : > { %3008 = vmatmul.msk.f32.vlgmr.msrb.gmra.mxu3 %vm803_vm7, %v950_v23 }
 0x454   : > { %3009 = vmatmul.msk.f32.vlgmr.msrb.gmra.mxu0 %vm803_vm7, %v951_v24  ;;  %1490 = vmatpush.bf16.xpose.msrb.mxu3 %v1481_v22 }
 0x455   : > { %1303 = vmatpush.bf16.msrb.mxu0 %v3640_v2 }
 0x459   : > { %1304 = vmatpush.bf16.msrb.mxu0 %v3646_v3 }
 0x45d   : > { %1305 = vmatpush.bf16.msrb.mxu0 %v3651_v4 }
 0x461   : > { %1306 = vmatpush.bf16.msrb.mxu0 %v3657_v5 }
 0x465   : > { %1307 = vmatpush.bf16.msrb.mxu0 %v3664_v6  ;;  %v1297_v6 = vpop.permute.xlu2 %1296 }
 0x466   : > { %vm1298_vm9 = vcmp.eq.s32.totalorder %v3686_v11, %v1297_v6 }
 0x467   : > { %vm3045_vm10 = vmpackc.low %vm1298_vm9, %vm1298_vm9 }
 0x469   : > { %1308 = vmatpush.bf16.msrb.mxu0 %v3670_v7 }
 0x46d   : > { %1309 = vmatpush.bf16.msrb.mxu0 %v3676_v8 }
 0x471   : > { %1310 = vmatpush.bf16.msrb.mxu0 %v3682_v9 }
 0x4cc   : > { %v972_v2 = vpop.f32.mrf.mxu2 }
 0x4cd   : > { %v1049_v3 = vpack.c.bf16 %v972_v2, %v972_v2  ;;  %v3050_v2 = vld [vmem:[%s4234_s4 + $0x3c] sm:$0xf] }
 0x4cf   : > { %3014 = vmatmul.msk.bf16.vlgmr.msrb.gmra.mxu1 %vm803_vm7, %v1049_v3  ;;  %v3065_v3 = vld [vmem:[%s4234_s4 + $0x58] sm:$0xf] }
 0x4d0   : > { %1392 = vmatpush.bf16.xpose.msrb.mxu1 %v1383_v28 }
 0x4d1   : > { %v1041_v35 = vpop.f32.mrf.mxu0 }
 0x4d2   : > { %v1052_v36 = vpack.c.bf16 %v1041_v35, %v1041_v35 }
 0x4d4   : > { %3017 = vmatmul.msk.bf16.vlgmr.msra.gmra.mxu0 %vm803_vm7, %v1052_v36  ;;  %v995_v37 = vpop.f32.mrf.mxu2  ;;  %v1415_v36 = vsel %vm517_vm2, %v3050_v2, 0 }
 0x4d5   : > { %v1050_v4 = vpack.c.bf16 %v995_v37, %v995_v37  ;;  %1376 = vmatpush.bf16.xpose.msra.mxu0 %v1367_v21  ;;  %v1563_v37 = vsel %vm517_vm2, %v3065_v3, 0  ;;  %v1438_v21 = vrot.slane %v3923_v18, 2  ;;  %v3929_v3 = vld [vmem:[#allocation5 + $0x6c] sm:$0xf] }
 0x4d6   : > { %v1018_v38 = vpop.f32.mrf.mxu3 }
 0x4d7   : > { %v1051_v5 = vpack.c.bf16 %v1018_v38, %v1018_v38  ;;  %3015 = vmatmul.msk.bf16.vlgmr.msra.gmra.mxu2 %vm803_vm7, %v1050_v4 }
 0x4d9   : > { %3016 = vmatmul.msk.bf16.vlgmr.msra.gmra.mxu3 %vm803_vm7, %v1051_v5 }
 0x4da   : > { %1572 = vmatpush.bf16.xpose.msra.mxu3 %v1563_v37 }
 0x4e4   : > { %3046 = vmatmul.msk.bf16.vlgmr.msrb.gmra.mxu0 %vm3045_vm10, %v3500_v13 }
 0x4e5   : > { %1424 = vmatpush.bf16.xpose.msrb.mxu0 %v1415_v36 }
 0x54c   : > { %v1069_v7 = vpop.f32.mrf.mxu1 }
 0x54d   : > { %v1130_v41 = vsel %vm517_vm2, %v1069_v7, 0.0  ;;  %v3262_v7 = vld [vmem:[#allocation5 + $0x42] ss:$0 sm:$0xff] }
 0x551   : > { %v1126_v8 = vpop.f32.mrf.mxu0 }
 0x552   : > { %v1135_v48 = vsel %vm517_vm2, %v1126_v8, 0.0 }
 0x554   : > { %v1071_v9 = vpop.f32.mrf.mxu1 }
 0x559   : > { %v1128_v39 = vpop.f32.mrf.mxu0 }
 0x55a   : > { %v1088_v40 = vpop.f32.mrf.mxu2  ;;  %v3263_v39 = vld [vmem:[#allocation5 + $0x43] ss:$0 sm:$0xff] }
 0x55b   : > { %v1131_v42 = vsel %vm517_vm2, %v1088_v40, 0.0 }
 0x55c   : > { %v1132_v43 = vadd.f32 %v1131_v42, %v1130_v41  ;;  %v1107_v44 = vpop.f32.mrf.mxu3 }
 0x55d   : > { %v1133_v45 = vsel %vm517_vm2, %v1107_v44, 0.0  ;;  %v3055_v44 = vld [vmem:[%s4234_s4 + $0x40] sm:$0xf] }
 0x55e   : > { %v1134_v46 = vadd.f32 %v1133_v45, %v1132_v43 }
 0x560   : > { %v1136_v50 = vadd.f32 %v1135_v48, %v1134_v46 }
 0x561   : > { %v1312_v13 = vpop.f32.mrf.mxu0 }
 0x562   : > { %v1090_v51 = vpop.f32.mrf.mxu2  ;;  %v1139_v52 = vadd.f32 %v3261_v47, %v1136_v50  ;;  %v1313_v53 = vadd.f32 %v1312_v13, %v1302_v49  ;;  %v3264_v47 = vld [vmem:[#allocation5 + $0x46] ss:$0 sm:$0xff]  ;;  %v1449_v49 = vsel %vm517_vm2, %v3055_v44, 0  ;;  %v3265_v13 = vld [vmem:[#allocation5 + $0x47] ss:$0 sm:$0xff] }
 0x564   : > { %v1109_v54 = vpop.f32.mrf.mxu3  ;;  %v1140_v55 = vadd.f32 %v1139_v52, %v3723_v58  ;;  %v1318_v56 = vsel %vm517_vm2, %v1313_v53, 0.0 }
 0x565   : > { %1319 = vadd.xlane.f32.xlu0 %v1318_v56 }
 0x566   : > { %v1143_v57 = vsel %vm517_vm2, %v1140_v55, 0.0 }
 0x567   : > { %1144 = vadd.xlane.f32.xlu1 %v1143_v57  ;;  %v3063_v57 = vld [vmem:[%s4234_s4 + $0x50] sm:$0xf] }
 0x569   : > { %v1314_v59 = vpop.f32.mrf.mxu0 }
 0x56a   : > { %v1531_v59 = vsel %vm517_vm2, %v3063_v57, 0 }
 0x5d8   : > { %v1320_v60 = vpop.xlane.xlu0 %1319 }
 0x5d9   : > { %v1321_v63 = vmul.f32 %v1320_v60, %v3691_v25  ;;  %v3066_v60 = vld [vmem:[%s4234_s4 + $0x5c] sm:$0xf] }
 0x5da   : > { %v1145_v61 = vpop.xlane.xlu1 %1144 }
 0x5db   : > { %v1146_v62 = vmul.f32 %v1145_v61, %v3691_v25  ;;  %v3833_v12 = vsub.f32 %v1313_v53, %v1321_v63  ;;  %v3058_v53 = vld [vmem:[%s4234_s4 + $0x4c] sm:$0xf]  ;;  %v1579_v61 = vsel %vm517_vm2, %v3066_v60, 0  ;;  %v3178_v63 = vld [vmem:[%s4236_s6 + $0x50] sm:$0xff] }
 0x5dc   : > { %v1497_v56 = vsel %vm517_vm2, %v3058_v53, 0 }
 0x5dd   : > { %v1147_v0 = vsub.f32 %v1140_v55, %v1146_v62  ;;  %v1323_v58 = vmul.f32 %v3833_v12, %v3833_v12  ;;  %v3179_v62 = vld [vmem:[%s4236_s6 + $0x58] sm:$0xff] }
 0x5de   : > { %1256 = vmatpush.bf16.msrb.mxu2 %v3179_v62 }
 0x5df   : > { %v1148_v1 = vmul.f32 %v1147_v0, %v1147_v0  ;;  %v1324_v15 = vsel %vm517_vm2, %v1323_v58, 0.0 }
 0x5e1   : > { %v1149_v14 = vsel %vm517_vm2, %v1148_v1, 0.0  ;;  %v3176_v1 = vld [vmem:[%s4236_s6 + $0x40] sm:$0xff] }
 0x5e2   : > { %1150 = vadd.xlane.f32.xlu1 %v1149_v14  ;;  %1257 = vmatpush.bf16.msrb.mxu2 %v3178_v63 }
 0x5ea   : > { %1325 = vadd.xlane.f32.xlu1 %v1324_v15  ;;  %v3049_v15 = vld [vmem:[%s4234_s4 + $0x38] sm:$0xf] }
 0x5eb   : > { %v1399_v16 = vsel %vm517_vm2, %v3049_v15, 0 }
 0x655   : > { %v1151_v20 = vpop.xlane.xlu1 %1150 }
 0x656   : > { %v1152_v23 = vmul.f32 %v1151_v20, %v3691_v25 }
 0x658   : > { %v1153_v24 = vadd.f32 1e-05, %v1152_v23 }
 0x65a   : > { %3301 = vrsqrt.f32 %v1153_v24  ;;  %vm1160_vm12 = vweird.f32 %v1153_v24 }
 0x65d   : > { %v1326_v27 = vpop.xlane.xlu1 %1325 }
 0x65e   : > { %v1327_v29 = vmul.f32 %v1326_v27, %v3691_v25  ;;  %v1442_v27 = vperm.slane %v1438_v21, 0 }
 0x660   : > { %v3302_v30 = vpop.eup %3301  ;;  %v1328_v32 = vadd.f32 1e-05, %v1327_v29 }
 0x661   : > { %v1155_v33 = vmul.f32 %v3302_v30, %v1153_v24  ;;  %vm1161_vm11 = vweird.f32 %v3302_v30 }
 0x662   : > { %3303 = vrsqrt.f32 %v1328_v32  ;;  %vm1162_vm13 = vmor %vm1160_vm12, %vm1161_vm11  ;;  %vm1335_vm14 = vweird.f32 %v1328_v32 }
 0x663   : > { %v1156_v34 = vmul.f32 %v3302_v30, %v1155_v33 }
 0x665   : > { %v1157_v35 = vmul.f32 0.5, %v1156_v34 }
 0x667   : > { %v1158_v4 = vsub.f32 1.5, %v1157_v35  ;;  %v3056_v35 = vld [vmem:[%s4234_s4 + $0x44] sm:$0xf] }
 0x668   : > { %v3304_v38 = vpop.eup %3303 }
 0x669   : > { %v1159_v5 = vmul.f32 %v3302_v30, %v1158_v4  ;;  %v1330_v6 = vmul.f32 %v3304_v38, %v1328_v32  ;;  %vm1336_vm15 = vweird.f32 %v3304_v38  ;;  %v1520_v4 = vrot.slane %v3929_v3, 2 }
 0x66a   : > { %vm1337_vm0 = vmor %vm1335_vm14, %vm1336_vm15 }
 0x66b   : > { %v1163_v8 = vsel %vm1162_vm13, %v3302_v30, %v1159_v5  ;;  %v1331_v9 = vmul.f32 %v3304_v38, %v1330_v6 }
 0x66c   : > { %v1164_v40 = vmul.f32 %v1163_v8, %v1147_v0  ;;  %v3177_v0 = vld [vmem:[%s4236_s6 + $0x48] sm:$0xff]  ;;  %v1524_v8 = vperm.slane %v1520_v4, 0 }
 0x66d   : > { %v1332_v41 = vmul.f32 0.5, %v1331_v9  ;;  %1258 = vmatpush.bf16.msrb.mxu2 %v3177_v0  ;;  %v1350_v9 = vld [vmem:[#allocation5 + $0x64] sm:$0xf] }
 0x66e   : > { %v1166_v42 = vmul.f32 %v3262_v7, %v1164_v40  ;;  %v1465_v7 = vsel %vm517_vm2, %v3056_v35, 0 }
 0x66f   : > { %v1333_v43 = vsub.f32 1.5, %v1332_v41 }
 0x670   : > { %v3864_v45 = vadd.f32 %v3263_v39, %v1166_v42  ;;  %v1440_v39 = vperm.slane %v3923_v18, 0  ;;  %v1355_v42 = vperm.slane %v1350_v9, 0 }
 0x671   : > { %v1334_v46 = vmul.f32 %v3304_v38, %v1333_v43  ;;  %1259 = vmatpush.bf16.msrb.mxu2 %v3176_v1  ;;  %v1521_v1 = vrot.slane %v3929_v3, 3 }
 0x672   : > { %v1173_v48 = vpack.c.bf16 %v3864_v45, %v3864_v45 }
 0x673   : > { %v1338_v50 = vsel %vm1337_vm0, %v3304_v38, %v1334_v46 }
 0x674   : > { %v1339_v51 = vmul.f32 %v1338_v50, %v3833_v12  ;;  %3026 = vmatmul.msk.bf16.vlgmr.msra.gmra.mxu1 %vm517_vm2, %v1173_v48  ;;  %v3266_v12 = vld [vmem:[#allocation5 + $0x53] ss:$0 sm:$0xff] }
 0x675   : > { %1458 = vmatpush.bf16.xpose.msra.mxu1 %v1449_v49  ;;  %1408 = vmatpush.bf16.xpose.msra.mxu2 %v1399_v16  ;;  %v1354_v49 = vrot.slane %v1350_v9, 3 }
 0x676   : > { %v1341_v52 = vmul.f32 %v3264_v47, %v1339_v51  ;;  %v1439_v47 = vrot.slane %v3923_v18, 3 }
 0x678   : > { %v3874_v54 = vadd.f32 %v3265_v13, %v1341_v52  ;;  %v1443_v50 = vperm.slane %v1439_v47, 0  ;;  %v3064_v13 = vld [vmem:[%s4234_s4 + $0x54] sm:$0xf]  ;;  %v1358_v52 = vperm.slane %v1354_v49, 0 }
 0x679   : > { %v1547_v57 = vsel %vm517_vm2, %v3064_v13, 0 }
 0x67a   : > { %v3878_v55 = vpack.c.bf16 %v3874_v54, %v3874_v54 }
 0x67c   : > { %3051 = vmatmul.msk.bf16.vlgmr.msra.gmra.mxu0 %vm517_vm2, %v3878_v55  ;;  %3061 = vmatmul.msk.bf16.vlgmr.msrb.gmra.mxu3 %vm517_vm2, %v3878_v55 }
 0x67d   : > { %1506 = vmatpush.bf16.xpose.msra.mxu0 %v1497_v56 }
 0x684   : > { %3052 = vmatmul.msk.bf16.vlgmr.msrb.gmra.mxu1 %vm517_vm2, %v3878_v55 }
 0x685   : > { %1540 = vmatpush.bf16.xpose.msrb.mxu1 %v1531_v59 }
 0x68c   : > { %3054 = vmatmul.msk.bf16.vlgmr.msrb.gmra.mxu0 %vm517_vm2, %v3878_v55  ;;  %3069 = vmatmul.msk.bf16.vlgmr.msra.gmra.mxu3 %vm517_vm2, %v3878_v55 }
 0x68d   : > { %1588 = vmatpush.bf16.xpose.msrb.mxu0 %v1579_v61  ;;  %v1522_v61 = vperm.slane %v3929_v3, 0 }
 0x694   : > { %3059 = vmatmul.msk.bf16.vlgmr.msra.gmra.mxu1 %vm517_vm2, %v3878_v55 }
 0x69c   : > { %3062 = vmatmul.msk.bf16.vlgmr.msra.gmra.mxu0 %vm517_vm2, %v3878_v55 }
 0x6a4   : > { %3067 = vmatmul.msk.bf16.vlgmr.msrb.gmra.mxu1 %vm517_vm2, %v3878_v55 }
 0x6ac   : > { %3070 = vmatmul.msk.bf16.vlgmr.msrb.gmra.mxu0 %vm517_vm2, %v3878_v55 }
 0x6f1   : > { %v1200_v14 = vpop.f32.mrf.mxu1 }
 0x6f2   : > { %v1201_v58 = vadd.f32 %v3266_v12, %v1200_v14  ;;  %v1525_v12 = vperm.slane %v1521_v1, 0 }
 0x6f4   : > { %v1205_v17 = vmul.f32 0.044715, %v1201_v58  ;;  %v1204_v34 = vmul.f32 0.5, %v1201_v58 }
 0x6f6   : > { %v1206_v19 = vmul.f32 %v1205_v17, %v1201_v58  ;;  %v442_v17 = vshrl.u32 %v436_v10, 7  ;;  %v1437_v10 = vrot.slane %v3923_v18, 1 }
 0x6f8   : > { %v1207_v20 = vmul.f32 %v1206_v19, %v1201_v58  ;;  %vm443_vm3 = vcmp.le.s32.totalorder %v3686_v11, %v442_v17 }
 0x6f9   : > { %v1202_v22 = vpop.f32.mrf.mxu1  ;;  %v1378_v23 = vpop.f32.mrf.mxu0 }
 0x6fa   : > { %v1208_v24 = vadd.f32 %v1207_v20, %v1201_v58  ;;  %v1379_v48 = vadd.f32 %v1378_v23, %v1355_v42  ;;  %v3502_v20 = vmov -1e+09  }
 0x6fb   : > { %v444_v21 = vsel %vm443_vm3, 0.0, %v3502_v20 }
 0x6fc   : > { %v1209_v26 = vmul.f32 0.7978846, %v1208_v24 }
 0x6fe   : > { %3305 = vtanh.f32 %v1209_v26 }
 0x6ff   : > { %v1492_v28 = vpop.f32.mrf.mxu3 }
 0x700   : > { %v1493_v29 = vadd.f32 %v1492_v28, %v1442_v27  ;;  %v1353_v27 = vrot.slane %v1350_v9, 2 }
 0x701   : > { %v1380_v30 = vpop.f32.mrf.mxu0  ;;  %v3926_v32 = vpop.f32.mrf.mxu1 }
 0x702   : > { %3075 = vmatpush.xpose.msk.msrb.mxu3 %vm803_vm7, %v1493_v29  ;;  %v1357_v28 = vperm.slane %v1353_v27, 0 }
 0x704   : > { %v3306_v33 = vpop.eup %3305 }
 0x705   : > { %v1211_v2 = vadd.f32 1.0, %v3306_v33  ;;  %v1352_v33 = vrot.slane %v1350_v9, 1 }
 0x707   : > { %v1494_v36 = vpop.f32.mrf.mxu3  ;;  %v1212_v37 = vmul.f32 %v1211_v2, %v1204_v34  ;;  %v1441_v34 = vperm.slane %v1437_v10, 0  ;;  %v1356_v2 = vperm.slane %v1352_v33, 0 }
 0x709   : > { %v1396_v38 = vpop.f32.mrf.mxu1  ;;  %v1426_v5 = vpop.f32.mrf.mxu0  ;;  %v1221_v6 = vpack.c.bf16 %v1212_v37, %v1212_v37  ;;  %v1395_v37 = vadd.f32 %v3926_v32, %v1356_v2  ;;  %v3085_v2 = vld [vmem:[%s4234_s4 + $0xa8] sm:$0xf] }
 0x70a   : > { %v1427_v60 = vadd.f32 %v1426_v5, %v1358_v52  ;;  %v1519_v38 = vrot.slane %v3929_v3, 1  ;;  %v3267_v52 = vld [vmem:[#allocation5 + $0x51] ss:$0 sm:$0xff] }
 0x70b   : > { %3043 = vmatmul.msk.bf16.vlgmr.msrb.gmra.mxu2 %vm1248_vm1, %v1221_v6 }
 0x70c   : > { %1474 = vmatpush.bf16.xpose.msrb.mxu2 %v1465_v7  ;;  %v1523_v5 = vperm.slane %v1519_v38, 0 }
 0x70f   : > { %v1574_v40 = vpop.f32.mrf.mxu3 }
 0x710   : > { %v1575_v41 = vadd.f32 %v1574_v40, %v1524_v8 }
 0x711   : > { %v1428_v43 = vpop.f32.mrf.mxu0  ;;  %v1460_v44 = vpop.f32.mrf.mxu1 }
 0x712   : > { %v1461_v46 = vadd.f32 %v1460_v44, %v1440_v39  ;;  %1806 = vmatpush.msra.mxu3 %v1575_v41 }
 0x714   : > { %3071 = vmatpush.xpose.msk.msra.mxu1 %vm803_vm7, %v1461_v46 }
 0x717   : > { %v1576_v51 = vpop.f32.mrf.mxu3  ;;  %3072 = vmatmul.msk.f32.vlgmr.msra.gmra.mxu1 %vm803_vm7, %v1379_v48 }
 0x719   : > { %v1462_v53 = vpop.f32.mrf.mxu1  ;;  %v1508_v56 = vpop.f32.mrf.mxu0 }
 0x71a   : > { %v1509_v59 = vadd.f32 %v1508_v56, %v1443_v50 }
 0x71b   : > { %3053 = vmatmul.msk.bf16.vlgmr.msra.gmra.mxu2 %vm517_vm2, %v3878_v55 }
 0x71c   : > { %3077 = vmatpush.xpose.msk.msra.mxu0 %vm803_vm7, %v1509_v59  ;;  %1556 = vmatpush.bf16.xpose.msra.mxu2 %v1547_v57 }
 0x71f   : > { %3078 = vmatmul.msk.f32.vlgmr.msra.gmra.mxu0 %vm803_vm7, %v1427_v60 }
 0x721   : > { %v1510_v62 = vpop.f32.mrf.mxu0  ;;  %v1542_v63 = vpop.f32.mrf.mxu1 }
 0x722   : > { %v1543_v0 = vadd.f32 %v1542_v63, %v1522_v61 }
 0x724   : > { %1760 = vmatpush.msrb.mxu1 %v1543_v0 }
 0x729   : > { %v1544_v14 = vpop.f32.mrf.mxu1  ;;  %v1590_v58 = vpop.f32.mrf.mxu0 }
 0x72a   : > { %v1591_v15 = vadd.f32 %v1590_v58, %v1525_v12 }
 0x72b   : > { %3060 = vmatmul.msk.bf16.vlgmr.msrb.gmra.mxu2 %vm517_vm2, %v3878_v55 }
 0x72c   : > { %1829 = vmatpush.msrb.mxu0 %v1591_v15 }
 0x731   : > { %v1592_v16 = vpop.f32.mrf.mxu0 }
 0x73b   : > { %3068 = vmatmul.msk.bf16.vlgmr.msra.gmra.mxu2 %vm517_vm2, %v3878_v55 }
 0x78e   : > { %v1261_v19 = vpop.f32.mrf.mxu2 }
 0x78f   : > { %v1262_v59 = vadd.f32 %v3267_v52, %v1261_v19 }
 0x791   : > { %v1265_v0 = vadd.f32 %v1262_v59, %v3864_v45 }
 0x793   : > { %v1268_v12 = vsel %vm517_vm2, %v1265_v0, 0.0 }
 0x794   : > { %v1617_v22 = vpop.f32.mrf.mxu1 }
 0x795   : > { %v1618_v23 = vadd.f32 %v1617_v22, %v444_v21 }
 0x796   : > { %v1263_v24 = vpop.f32.mrf.mxu2 }
 0x797   : > { %v1698_v26 = vsel %vm803_vm7, %v1618_v23, -inf }
 0x798   : > { %1699 = vmax.xlane.f32.xlu1 %v1698_v26 }
 0x79c   : > { %v1695_v40 = vpop.f32.mrf.mxu0 }
 0x79d   : > { %v1696_v41 = vadd.f32 %v1695_v40, %v444_v21 }
 0x79e   : > { %v1410_v29 = vpop.f32.mrf.mxu2 }
 0x79f   : > { %v1411_v30 = vadd.f32 %v1410_v29, %v1357_v28  ;;  %v1707_v42 = vsel %vm803_vm7, %v1696_v41, -inf }
 0x7a1   : > { %3076 = vmatmul.msk.f32.vlgmr.msrb.gmra.mxu3 %vm803_vm7, %v1411_v30 }
 0x7a6   : > { %v1412_v55 = vpop.f32.mrf.mxu2 }
 0x7ae   : > { %v1476_v35 = vpop.f32.mrf.mxu2 }
 0x7af   : > { %v1477_v36 = vadd.f32 %v1476_v35, %v1441_v34  ;;  %v1885_v35 = vsel %vm1056_vm8, %v3085_v2, 0 }
 0x7b0   : > { %1894 = vmatpush.bf16.msrb.mxu3 %v1885_v35 }
 0x7b1   : > { %3073 = vmatpush.xpose.msk.msrb.mxu2 %vm803_vm7, %v1477_v36  ;;  %v3086_v36 = vld [vmem:[%s4234_s4 + $0xac] sm:$0xf] }
 0x7b4   : > { %3074 = vmatmul.msk.f32.vlgmr.msrb.gmra.mxu2 %vm803_vm7, %v1395_v37  ;;  %v1904_v37 = vsel %vm1056_vm8, %v3086_v36, 0 }
 0x7b5   : > { %1913 = vmatpush.bf16.msra.mxu0 %v1904_v37 }
 0x7b6   : > { %v1478_v4 = vpop.f32.mrf.mxu2 }
 0x7b7   : > { %v3084_v4 = vld [vmem:[%s4234_s4 + $0xa4] sm:$0xf] }
 0x7b8   : > { %v1866_v38 = vsel %vm1056_vm8, %v3084_v4, 0 }
 0x7be   : > { %v1558_v6 = vpop.f32.mrf.mxu2 }
 0x7bf   : > { %v1559_v7 = vadd.f32 %v1558_v6, %v1523_v5  ;;  %v3083_v5 = vld [vmem:[%s4234_s4 + $0xa0] sm:$0xf] }
 0x7c0   : > { %v1847_v6 = vsel %vm1056_vm8, %v3083_v5, 0 }
 0x7c1   : > { %1783 = vmatpush.msra.mxu2 %v1559_v7  ;;  %1856 = vmatpush.bf16.msra.mxu1 %v1847_v6 }
 0x7c3   : > { %1875 = vmatpush.bf16.msrb.mxu2 %v1866_v38 }
 0x7c6   : > { %v1560_v8 = vpop.f32.mrf.mxu2 }
 0x80b   : > { %v1700_v56 = vpop.xlane.xlu1 %1699 }
 0x80c   : > { %v1710_v62 = vsub.f32 %v1618_v23, %v1700_v56 }
 0x80e   : > { %v1714_v1 = vmul.f32 1.442695, %v1710_v62 }
 0x824   : > { %v1669_v18 = vpop.f32.mrf.mxu3 }
 0x825   : > { %v1670_v9 = vadd.f32 %v1669_v18, %v444_v21 }
 0x827   : > { %v1704_v39 = vsel %vm803_vm7, %v1670_v9, -inf }
 0x828   : > { %1705 = vmax.xlane.f32.xlu0 %v1704_v39 }
 0x830   : > { %1708 = vmax.xlane.f32.xlu0 %v1707_v42 }
 0x837   : > { %v1643_v32 = vpop.f32.mrf.mxu2 }
 0x838   : > { %v1644_v43 = vadd.f32 %v1643_v32, %v444_v21 }
 0x83a   : > { %v1701_v44 = vsel %vm803_vm7, %v1644_v43, -inf }
 0x83b   : > { %1702 = vmax.xlane.f32.xlu2 %v1701_v44 }
 0x89b   : > { %v1706_v3 = vpop.xlane.xlu0 %1705 }
 0x89c   : > { %v1712_v46 = vsub.f32 %v1670_v9, %v1706_v3 }
 0x89e   : > { %v1718_v47 = vmul.f32 1.442695, %v1712_v46 }
 0x8a0   : > { %3307 = vpow2.f32 %v1718_v47 }
 0x8a3   : > { %v1709_v48 = vpop.xlane.xlu0 %1708 }
 0x8a4   : > { %v1713_v49 = vsub.f32 %v1696_v41, %v1709_v48 }
 0x8a6   : > { %v3308_v50 = vpop.eup %3307  ;;  %v1720_v13 = vmul.f32 1.442695, %v1713_v49 }
 0x8a7   : > { %v1728_v51 = vsel %vm803_vm7, %v3308_v50, 0.0 }
 0x8a8   : > { %3309 = vpow2.f32 %v1720_v13  ;;  %1729 = vadd.xlane.f32.xlu0 %v1728_v51 }
 0x8ae   : > { %v3310_v53 = vpop.eup %3309  ;;  %v1703_v57 = vpop.xlane.xlu2 %1702 }
 0x8af   : > { %v1711_v60 = vsub.f32 %v1644_v43, %v1703_v57  ;;  %v1731_v61 = vsel %vm803_vm7, %v3310_v53, 0.0 }
 0x8b0   : > { %1732 = vadd.xlane.f32.xlu0 %v1731_v61 }
 0x8b1   : > { %v1716_v63 = vmul.f32 1.442695, %v1711_v60 }
 0x8b3   : > { %3311 = vpow2.f32 %v1716_v63 }
 0x8b4   : > { %3313 = vpow2.f32 %v1714_v1 }
 0x8b8   : > { %1269 = vadd.xlane.f32.xlu0 %v1268_v12 }
 0x8b9   : > { %v3312_v14 = vpop.eup %3311 }
 0x8ba   : > { %v1725_v58 = vsel %vm803_vm7, %v3312_v14, 0.0  ;;  %v3314_v15 = vpop.eup %3313 }
 0x8bb   : > { %1726 = vadd.xlane.f32.xlu1 %v1725_v58  ;;  %v1722_v16 = vsel %vm803_vm7, %v3314_v15, 0.0 }
 0x8c3   : > { %1723 = vadd.xlane.f32.xlu1 %v1722_v16  ;;  %v3093_v16 = vld [vmem:[%s4234_s4 + $0x68] sm:$0xf] }
 0x91b   : > { %v1730_v17 = vpop.xlane.xlu0 %1729 }
 0x91c   : > { %3315 = vrcp.f32 %v1730_v17 }
 0x922   : > { %v3316_v19 = vpop.eup %3315 }
 0x923   : > { %v1740_v20 = vmul.f32 %v3316_v19, %v3308_v50  ;;  %v1733_v21 = vpop.xlane.xlu0 %1732 }
 0x924   : > { %3317 = vrcp.f32 %v1733_v21  ;;  %v2014_v21 = vsel %vm517_vm2, %v3093_v16, 0 }
 0x925   : > { %3081 = vmatmul.msk.f32.vlgmr.msra.gmra.mxu3 %vm803_vm7, %v1740_v20 }
 0x926   : > { %2023 = vmatpush.bf16.xpose.msra.mxu3 %v2014_v21 }
 0x92a   : > { %v3318_v45 = vpop.eup %3317 }
 0x92b   : > { %v1741_v22 = vmul.f32 %v3318_v45, %v3310_v53  ;;  %v1270_v23 = vpop.xlane.xlu0 %1269  ;;  %v3270_v53 = vld [vmem:[#allocation5 + $0x4f] ss:$0 sm:$0xff] }
 0x92c   : > { %v1271_v24 = vmul.f32 %v1270_v23, %v3691_v25  ;;  %v3094_v45 = vld [vmem:[%s4234_s4 + $0x6c] sm:$0xf] }
 0x92d   : > { %3082 = vmatmul.msk.f32.vlgmr.msrb.gmra.mxu0 %vm803_vm7, %v1741_v22  ;;  %v2030_v22 = vsel %vm517_vm2, %v3094_v45, 0 }
 0x92e   : > { %v3976_v26 = vsub.f32 %v1265_v0, %v1271_v24  ;;  %v1727_v27 = vpop.xlane.xlu1 %1726  ;;  %2039 = vmatpush.bf16.xpose.msrb.mxu0 %v2030_v22 }
 0x92f   : > { %3319 = vrcp.f32 %v1727_v27  ;;  %v3099_v27 = vld [vmem:[%s4234_s4 + $0x70] sm:$0xf] }
 0x930   : > { %v1273_v28 = vmul.f32 %v3976_v26, %v3976_v26 }
 0x932   : > { %v1274_v29 = vsel %vm517_vm2, %v1273_v28, 0.0  ;;  %v3100_v28 = vld [vmem:[%s4234_s4 + $0x74] sm:$0xf] }
 0x933   : > { %1275 = vadd.xlane.f32.xlu2 %v1274_v29  ;;  %v3101_v29 = vld [vmem:[%s4234_s4 + $0x78] sm:$0xf] }
 0x935   : > { %v3320_v30 = vpop.eup %3319 }
 0x936   : > { %v1739_v55 = vmul.f32 %v3320_v30, %v3312_v14  ;;  %v1724_v10 = vpop.xlane.xlu1 %1723 }
 0x937   : > { %3321 = vrcp.f32 %v1724_v10  ;;  %v2083_v10 = vsel %vm517_vm2, %v3100_v28, 0 }
 0x938   : > { %3080 = vmatmul.msk.f32.vlgmr.msra.gmra.mxu2 %vm803_vm7, %v1739_v55  ;;  %v2067_v55 = vsel %vm517_vm2, %v3099_v27, 0 }
 0x93d   : > { %v3322_v33 = vpop.eup %3321 }
 0x93e   : > { %v1738_v34 = vmul.f32 %v3322_v33, %v3314_v15  ;;  %v3091_v15 = vld [vmem:[%s4234_s4 + $0x60] sm:$0xf]  ;;  %v2099_v33 = vsel %vm517_vm2, %v3101_v29, 0 }
 0x93f   : > { %v1982_v19 = vsel %vm517_vm2, %v3091_v15, 0 }
 0x940   : > { %3079 = vmatmul.msk.f32.vlgmr.msrb.gmra.mxu1 %vm803_vm7, %v1738_v34  ;;  %v3102_v34 = vld [vmem:[%s4234_s4 + $0x7c] sm:$0xf] }
 0x941   : > { %1991 = vmatpush.bf16.xpose.msrb.mxu1 %v1982_v19  ;;  %v2115_v2 = vsel %vm517_vm2, %v3102_v34, 0 }
 0x9a6   : > { %v1276_v58 = vpop.xlane.xlu2 %1275 }
 0x9a7   : > { %v1277_v17 = vmul.f32 %v1276_v58, %v3691_v25 }
 0x9a8   : > { %v1808_v7 = vpop.f32.mrf.mxu3 }
 0x9a9   : > { %v1841_v8 = vpack.c.bf16 %v1808_v7, %v1808_v7  ;;  %v1278_v23 = vadd.f32 1e-05, %v1277_v17 }
 0x9aa   : > { %v1831_v18 = vpop.f32.mrf.mxu0 }
 0x9ab   : > { %v1842_v9 = vpack.c.bf16 %v1831_v18, %v1831_v18  ;;  %3089 = vmatmul.msk.bf16.vlgmr.msrb.gmra.mxu3 %vm803_vm7, %v1841_v8  ;;  %3323 = vrsqrt.f32 %v1278_v23  ;;  %vm1285_vm10 = vweird.f32 %v1278_v23 }
 0x9ac   : > { %2108 = vmatpush.bf16.xpose.msrb.mxu3 %v2099_v33 }
 0x9ad   : > { %3090 = vmatmul.msk.bf16.vlgmr.msra.gmra.mxu0 %vm803_vm7, %v1842_v9 }
 0x9ae   : > { %2124 = vmatpush.bf16.xpose.msra.mxu0 %v2115_v2 }
 0x9b1   : > { %v3324_v36 = vpop.eup %3323 }
 0x9b2   : > { %v1280_v37 = vmul.f32 %v3324_v36, %v1278_v23  ;;  %vm1286_vm9 = vweird.f32 %v3324_v36 }
 0x9b3   : > { %vm1287_vm11 = vmor %vm1285_vm10, %vm1286_vm9 }
 0x9b4   : > { %v1281_v5 = vmul.f32 %v3324_v36, %v1280_v37 }
 0x9b6   : > { %v1282_v8 = vmul.f32 0.5, %v1281_v5 }
 0x9bb   : > { %v1785_v39 = vpop.f32.mrf.mxu2 }
 0x9bc   : > { %v1840_v40 = vpack.c.bf16 %v1785_v39, %v1785_v39  ;;  %v3271_v39 = vld [vmem:[#allocation5 + $0x48] ss:$0 sm:$0xff] }
 0x9bd   : > { %v1762_v41 = vpop.f32.mrf.mxu1 }
 0x9be   : > { %v1839_v42 = vpack.c.bf16 %v1762_v41, %v1762_v41  ;;  %3088 = vmatmul.msk.bf16.vlgmr.msrb.gmra.mxu2 %vm803_vm7, %v1840_v40  ;;  %v1283_v40 = vsub.f32 1.5, %v1282_v8 }
 0x9c0   : > { %3087 = vmatmul.msk.bf16.vlgmr.msra.gmra.mxu1 %vm803_vm7, %v1839_v42  ;;  %v3272_v42 = vld [vmem:[#allocation5 + $0x49] ss:$0 sm:$0xff] }
 0x9c1   : > { %2076 = vmatpush.bf16.xpose.msra.mxu1 %v2067_v55 }
 0xa2a   : > { %v1915_v32 = vpop.f32.mrf.mxu0 }
 0xa2b   : > { %v1924_v56 = vsel %vm517_vm2, %v1915_v32, 0.0 }
 0xa2e   : > { %v1896_v43 = vpop.f32.mrf.mxu3 }
 0xa2f   : > { %v1922_v13 = vsel %vm517_vm2, %v1896_v43, 0.0 }
 0xa32   : > { %v1917_v44 = vpop.f32.mrf.mxu0 }
 0xa33   : > { %v1284_v44 = vmul.f32 %v3324_v36, %v1283_v40 }
 0xa36   : > { %v1898_v3 = vpop.f32.mrf.mxu3 }
 0xa3d   : > { %v1858_v46 = vpop.f32.mrf.mxu1 }
 0xa3e   : > { %v1919_v48 = vsel %vm517_vm2, %v1858_v46, 0.0  ;;  %v3107_v46 = vld [vmem:[%s4234_s4 + $0x80] sm:$0xf] }
 0xa41   : > { %v1877_v47 = vpop.f32.mrf.mxu2 }
 0xa42   : > { %v1920_v49 = vsel %vm517_vm2, %v1877_v47, 0.0  ;;  %v3108_v47 = vld [vmem:[%s4234_s4 + $0x84] sm:$0xf] }
 0xa43   : > { %v1921_v50 = vadd.f32 %v1920_v49, %v1919_v48  ;;  %v3109_v48 = vld [vmem:[%s4234_s4 + $0x88] sm:$0xf]  ;;  %v3110_v49 = vld [vmem:[%s4234_s4 + $0x8c] sm:$0xf] }
 0xa45   : > { %v1923_v51 = vadd.f32 %v1922_v13, %v1921_v50  ;;  %v1860_v52 = vpop.f32.mrf.mxu1  ;;  %v1288_v13 = vsel %vm1287_vm11, %v3324_v36, %v1284_v44 }
 0xa46   : > { %v2165_v52 = vsel %vm517_vm2, %v3108_v47, 0 }
 0xa47   : > { %v1925_v57 = vadd.f32 %v1924_v56, %v1923_v51  ;;  %v2149_v51 = vsel %vm517_vm2, %v3107_v46, 0  ;;  %v2197_v56 = vsel %vm517_vm2, %v3110_v49, 0 }
 0xa49   : > { %v1879_v59 = vpop.f32.mrf.mxu2  ;;  %v1928_v60 = vadd.f32 %v3270_v53, %v1925_v57  ;;  %v2181_v53 = vsel %vm517_vm2, %v3109_v48, 0  ;;  %v3268_v57 = vld [vmem:[#allocation5 + $0x44] ss:$0 sm:$0xff] }
 0xa4a   : > { %v1289_v59 = vmul.f32 %v1288_v13, %v3976_v26 }
 0xa4b   : > { %v1929_v61 = vadd.f32 %v1928_v60, %v3874_v54  ;;  %v3092_v54 = vld [vmem:[%s4234_s4 + $0x64] sm:$0xf] }
 0xa4c   : > { %v1998_v20 = vsel %vm517_vm2, %v3092_v54, 0  ;;  %v3269_v60 = vld [vmem:[#allocation5 + $0x45] ss:$0 sm:$0xff]  ;;  %v1965_v54 = vld [vmem:[#allocation5 + $0x70] sm:$0xf] }
 0xa4d   : > { %v1932_v62 = vsel %vm517_vm2, %v1929_v61, 0.0  ;;  %2007 = vmatpush.bf16.xpose.msra.mxu2 %v1998_v20  ;;  %v1969_v17 = vrot.slane %v1965_v54, 3  ;;  %v1970_v23 = vperm.slane %v1965_v54, 0  ;;  %v1967_v55 = vrot.slane %v1965_v54, 1 }
 0xa4e   : > { %1933 = vadd.xlane.f32.xlu1 %v1932_v62  ;;  %v1968_v33 = vrot.slane %v1965_v54, 2 }
 0xa4f   : > { %v1973_v28 = vperm.slane %v1969_v17, 0  ;;  %v1971_v37 = vperm.slane %v1967_v55, 0 }
 0xa55   : > { %2092 = vmatpush.bf16.xpose.msrb.mxu2 %v2083_v10 }
 0xac1   : > { %v1934_v63 = vpop.xlane.xlu1 %1933 }
 0xac2   : > { %v1935_v0 = vmul.f32 %v1934_v63, %v3691_v25 }
 0xac4   : > { %v1936_v1 = vsub.f32 %v1929_v61, %v1935_v0  ;;  %v1291_v61 = vmul.f32 %v3268_v57, %v1289_v59 }
 0xac6   : > { %v1937_v12 = vmul.f32 %v1936_v1, %v1936_v1  ;;  %v1293_v62 = vadd.f32 %v3269_v60, %v1291_v61 }
 0xac8   : > { %v1938_v14 = vsel %vm517_vm2, %v1937_v12, 0.0  ;;  %v1959_v63 = vpack.c.bf16 %v1293_v62, %v1293_v62 }
 0xac9   : > { %1939 = vadd.xlane.f32.xlu1 %v1938_v14  ;;  %v2050_v14 = vld [vmem:[#allocation5 + $0x74] sm:$0xf] }
 0xaca   : > { %v2054_v16 = vrot.slane %v2050_v14, 3  ;;  %v2055_v19 = vperm.slane %v2050_v14, 0  ;;  %v2052_v22 = vrot.slane %v2050_v14, 1  ;;  %v2053_v27 = vrot.slane %v2050_v14, 2 }
 0xacc   : > { %v2058_v21 = vperm.slane %v2054_v16, 0  ;;  %v2056_v34 = vperm.slane %v2052_v22, 0 }
 0xb3c   : > { %v1940_v24 = vpop.xlane.xlu1 %1939 }
 0xb3d   : > { %v1941_v30 = vmul.f32 %v1940_v24, %v3691_v25 }
 0xb3f   : > { %v1942_v35 = vadd.f32 1e-05, %v1941_v30 }
 0xb41   : > { %3325 = vrsqrt.f32 %v1942_v35  ;;  %vm1949_vm5 = vweird.f32 %v1942_v35 }
 0xb47   : > { %v3326_v4 = vpop.eup %3325 }
 0xb48   : > { %v1944_v38 = vmul.f32 %v3326_v4, %v1942_v35  ;;  %vm1950_vm4 = vweird.f32 %v3326_v4  ;;  %v2057_v35 = vperm.slane %v2053_v27, 0 }
 0xb49   : > { %vm1951_vm6 = vmor %vm1949_vm5, %vm1950_vm4 }
 0xb4a   : > { %v1945_v6 = vmul.f32 %v3326_v4, %v1944_v38  ;;  %v1972_v38 = vperm.slane %v1968_v33, 0 }
 0xb4c   : > { %v1946_v7 = vmul.f32 0.5, %v1945_v6 }
 0xb4e   : > { %v1947_v18 = vsub.f32 1.5, %v1946_v7  ;;  %v2135_v7 = vld [vmem:[#allocation5 + $0x78] sm:$0xf] }
 0xb4f   : > { %v2139_v40 = vrot.slane %v2135_v7, 3  ;;  %v2137_v46 = vrot.slane %v2135_v7, 1  ;;  %v2138_v48 = vrot.slane %v2135_v7, 2 }
 0xb50   : > { %v1948_v9 = vmul.f32 %v3326_v4, %v1947_v18 }
 0xb52   : > { %v1952_v41 = vsel %vm1951_vm6, %v3326_v4, %v1948_v9 }
 0xb53   : > { %v1953_v32 = vmul.f32 %v1952_v41, %v1936_v1 }
 0xb55   : > { %v1955_v43 = vmul.f32 %v3271_v39, %v1953_v32 }
 0xb57   : > { %v4045_v3 = vadd.f32 %v3272_v42, %v1955_v43  ;;  %v2140_v42 = vperm.slane %v2135_v7, 0  ;;  %v2143_v43 = vperm.slane %v2139_v40, 0 }
 0xb59   : > { %v1958_v50 = vpack.c.bf16 %v4045_v3, %v4045_v3 }
 0xb5b   : > { %3095 = vmatmul.msk.bf16.vlgmr.msrb.gmra.mxu1 %vm517_vm2, %v1958_v50  ;;  %3096 = vmatmul.msk.bf16.vlgmr.msra.gmra.mxu2 %vm517_vm2, %v1958_v50 }
 0xb5c   : > { %3097 = vmatmul.msk.bf16.vlgmr.msra.gmra.mxu3 %vm517_vm2, %v1958_v50  ;;  %3098 = vmatmul.msk.bf16.vlgmr.msrb.gmra.mxu0 %vm517_vm2, %v1958_v50 }
 0xb5d   : > { %2158 = vmatpush.bf16.xpose.msrb.mxu1 %v2149_v51  ;;  %2174 = vmatpush.bf16.xpose.msra.mxu2 %v2165_v52  ;;  %v2141_v51 = vperm.slane %v2137_v46, 0  ;;  %v2142_v52 = vperm.slane %v2138_v48, 0  ;;  %v3129_v48 = vld [vmem:[%s4234_s4 + $0xb8] sm:$0xf] }
 0xb5e   : > { %2190 = vmatpush.bf16.xpose.msra.mxu3 %v2181_v53  ;;  %2206 = vmatpush.bf16.xpose.msrb.mxu0 %v2197_v56 }
 0xb6b   : > { %3103 = vmatmul.msk.bf16.vlgmr.msra.gmra.mxu1 %vm517_vm2, %v1959_v63  ;;  %3104 = vmatmul.msk.bf16.vlgmr.msrb.gmra.mxu2 %vm517_vm2, %v1959_v63 }
 0xb6c   : > { %3105 = vmatmul.msk.bf16.vlgmr.msrb.gmra.mxu3 %vm517_vm2, %v1959_v63  ;;  %3106 = vmatmul.msk.bf16.vlgmr.msra.gmra.mxu0 %vm517_vm2, %v1959_v63 }
 0xb7b   : > { %3111 = vmatmul.msk.bf16.vlgmr.msrb.gmra.mxu1 %vm517_vm2, %v1959_v63  ;;  %3112 = vmatmul.msk.bf16.vlgmr.msra.gmra.mxu2 %vm517_vm2, %v1959_v63 }
 0xb7c   : > { %3113 = vmatmul.msk.bf16.vlgmr.msra.gmra.mxu3 %vm517_vm2, %v1959_v63  ;;  %3114 = vmatmul.msk.bf16.vlgmr.msrb.gmra.mxu0 %vm517_vm2, %v1959_v63 }
 0xbd8   : > { %v1993_v26 = vpop.f32.mrf.mxu1 }
 0xbd9   : > { %v2041_v0 = vpop.f32.mrf.mxu0  ;;  %v1994_v2 = vadd.f32 %v1993_v26, %v1970_v23 }
 0xbda   : > { %v2042_v36 = vadd.f32 %v2041_v0, %v1973_v28 }
 0xbde   : > { %v2009_v1 = vpop.f32.mrf.mxu2 }
 0xbdf   : > { %v2025_v12 = vpop.f32.mrf.mxu3  ;;  %v2010_v39 = vadd.f32 %v2009_v1, %v1971_v37 }
 0xbe0   : > { %v1995_v58 = vpop.f32.mrf.mxu1  ;;  %v2026_v41 = vadd.f32 %v2025_v12, %v1972_v38 }
 0xbe1   : > { %v2043_v15 = vpop.f32.mrf.mxu0 }
 0xbe6   : > { %v2011_v20 = vpop.f32.mrf.mxu2 }
 0xbe7   : > { %v2027_v45 = vpop.f32.mrf.mxu3 }
 0xbe8   : > { %v2078_v24 = vpop.f32.mrf.mxu1 }
 0xbe9   : > { %v2079_v29 = vadd.f32 %v2078_v24, %v2055_v19  ;;  %v2126_v30 = vpop.f32.mrf.mxu0 }
 0xbea   : > { %v2127_v10 = vadd.f32 %v2126_v30, %v2058_v21 }
 0xbeb   : > { %3115 = vmatpush.xpose.msk.msra.mxu1 %vm803_vm7, %v2079_v29 }
 0xbec   : > { %3121 = vmatpush.xpose.msk.msra.mxu0 %vm803_vm7, %v2127_v10 }
 0xbee   : > { %v2094_v4 = vpop.f32.mrf.mxu2  ;;  %3116 = vmatmul.msk.f32.vlgmr.msra.gmra.mxu1 %vm803_vm7, %v1994_v2 }
 0xbef   : > { %v2095_v5 = vadd.f32 %v2094_v4, %v2056_v34  ;;  %v2110_v6 = vpop.f32.mrf.mxu3  ;;  %3122 = vmatmul.msk.f32.vlgmr.msra.gmra.mxu0 %vm803_vm7, %v2042_v36 }
 0xbf0   : > { %v2111_v8 = vadd.f32 %v2110_v6, %v2057_v35  ;;  %v2080_v18 = vpop.f32.mrf.mxu1 }
 0xbf1   : > { %v2128_v9 = vpop.f32.mrf.mxu0  ;;  %3117 = vmatpush.xpose.msk.msrb.mxu2 %vm803_vm7, %v2095_v5 }
 0xbf2   : > { %3119 = vmatpush.xpose.msk.msrb.mxu3 %vm803_vm7, %v2111_v8 }
 0xbf4   : > { %3118 = vmatmul.msk.f32.vlgmr.msrb.gmra.mxu2 %vm803_vm7, %v2010_v39 }
 0xbf5   : > { %3120 = vmatmul.msk.f32.vlgmr.msrb.gmra.mxu3 %vm803_vm7, %v2026_v41 }
 0xbf6   : > { %v2096_v32 = vpop.f32.mrf.mxu2 }
 0xbf7   : > { %v2112_v44 = vpop.f32.mrf.mxu3 }
 0xbf8   : > { %v2160_v47 = vpop.f32.mrf.mxu1  ;;  %v3127_v44 = vld [vmem:[%s4234_s4 + $0xb0] sm:$0xf] }
 0xbf9   : > { %v2161_v49 = vadd.f32 %v2160_v47, %v2140_v42  ;;  %v2208_v50 = vpop.f32.mrf.mxu0  ;;  %v2465_v46 = vsel %vm1056_vm8, %v3127_v44, 0  ;;  %v3128_v47 = vld [vmem:[%s4234_s4 + $0xb4] sm:$0xf] }
 0xbfa   : > { %v2209_v13 = vadd.f32 %v2208_v50, %v2143_v43  ;;  %v2503_v50 = vsel %vm1056_vm8, %v3129_v48, 0  ;;  %v3276_v44 = vld [vmem:[#allocation5 + $0x54] ss:$0 sm:$0xff] }
 0xbfb   : > { %2378 = vmatpush.msrb.mxu1 %v2161_v49  ;;  %v2484_v49 = vsel %vm1056_vm8, %v3128_v47, 0 }
 0xbfc   : > { %2447 = vmatpush.msrb.mxu0 %v2209_v13  ;;  %v3130_v13 = vld [vmem:[%s4234_s4 + $0xbc] sm:$0xf] }
 0xbfd   : > { %2474 = vmatpush.bf16.msra.mxu1 %v2465_v46 }
 0xbfe   : > { %v2176_v53 = vpop.f32.mrf.mxu2 }
 0xbff   : > { %v2177_v56 = vadd.f32 %v2176_v53, %v2141_v51  ;;  %v2192_v57 = vpop.f32.mrf.mxu3  ;;  %v2522_v51 = vsel %vm1056_vm8, %v3130_v13, 0 }
 0xc00   : > { %v2193_v59 = vadd.f32 %v2192_v57, %v2142_v52  ;;  %v2162_v60 = vpop.f32.mrf.mxu1  ;;  %2531 = vmatpush.bf16.msra.mxu0 %v2522_v51 }
 0xc01   : > { %v2210_v61 = vpop.f32.mrf.mxu0  ;;  %2401 = vmatpush.msra.mxu2 %v2177_v56 }
 0xc02   : > { %2424 = vmatpush.msra.mxu3 %v2193_v59 }
 0xc03   : > { %2493 = vmatpush.bf16.msrb.mxu2 %v2484_v49 }
 0xc04   : > { %2512 = vmatpush.bf16.msrb.mxu3 %v2503_v50 }
 0xc06   : > { %v2178_v62 = vpop.f32.mrf.mxu2 }
 0xc07   : > { %v2194_v63 = vpop.f32.mrf.mxu3 }
 0xc6b   : > { %v2235_v26 = vpop.f32.mrf.mxu1 }
 0xc6c   : > { %v2236_v0 = vadd.f32 %v2235_v26, %v3772_v31  ;;  %v2313_v16 = vpop.f32.mrf.mxu0 }
 0xc6d   : > { %v2314_v19 = vadd.f32 %v2313_v16, %v3772_v31 }
 0xc6e   : > { %v2316_v1 = vsel %vm803_vm7, %v2236_v0, -inf }
 0xc6f   : > { %2317 = vmax.xlane.f32.xlu2 %v2316_v1  ;;  %v2325_v20 = vsel %vm803_vm7, %v2314_v19, -inf }
 0xc77   : > { %v2261_v12 = vpop.f32.mrf.mxu2 }
 0xc78   : > { %v2262_v14 = vadd.f32 %v2261_v12, %v3772_v31  ;;  %v2287_v58 = vpop.f32.mrf.mxu3 }
 0xc79   : > { %v2288_v15 = vadd.f32 %v2287_v58, %v3772_v31 }
 0xc7a   : > { %v2319_v54 = vsel %vm803_vm7, %v2262_v14, -inf }
 0xc7b   : > { %v2322_v17 = vsel %vm803_vm7, %v2288_v15, -inf  ;;  %2320 = vmax.xlane.f32.xlu0 %v2319_v54 }
 0xc7c   : > { %2323 = vmax.xlane.f32.xlu1 %v2322_v17 }
 0xc83   : > { %2326 = vmax.xlane.f32.xlu0 %v2325_v20 }
 0xce2   : > { %v2318_v21 = vpop.xlane.xlu2 %2317 }
 0xce3   : > { %v2328_v45 = vsub.f32 %v2236_v0, %v2318_v21 }
 0xce5   : > { %v2332_v22 = vmul.f32 1.442695, %v2328_v45 }
 0xce7   : > { %3327 = vpow2.f32 %v2332_v22 }
 0xced   : > { %v3328_v23 = vpop.eup %3327 }
 0xcee   : > { %v2321_v24 = vpop.xlane.xlu0 %2320  ;;  %v2340_v27 = vsel %vm803_vm7, %v3328_v23, 0.0 }
 0xcef   : > { %v2324_v28 = vpop.xlane.xlu1 %2323  ;;  %v2329_v29 = vsub.f32 %v2262_v14, %v2321_v24  ;;  %2341 = vadd.xlane.f32.xlu0 %v2340_v27 }
 0xcf0   : > { %v2330_v30 = vsub.f32 %v2288_v15, %v2324_v28 }
 0xcf1   : > { %v2334_v55 = vmul.f32 1.442695, %v2329_v29 }
 0xcf2   : > { %v2336_v10 = vmul.f32 1.442695, %v2330_v30 }
 0xcf3   : > { %3329 = vpow2.f32 %v2334_v55 }
 0xcf4   : > { %3331 = vpow2.f32 %v2336_v10 }
 0xcf6   : > { %v2327_v31 = vpop.xlane.xlu0 %2326 }
 0xcf7   : > { %v2331_v33 = vsub.f32 %v2314_v19, %v2327_v31  ;;  %v3273_v19 = vld [vmem:[#allocation5 + $0x50] ss:$0 sm:$0xff]  ;;  %v3181_v31 = vld [vmem:[#allocation2 + $0x18] sm:$0xff] }
 0xcf9   : > { %v3330_v34 = vpop.eup %3329  ;;  %v2338_v2 = vmul.f32 1.442695, %v2331_v33  ;;  %v3180_v33 = vld [vmem:[#allocation2 + $0x10] sm:$0xff] }
 0xcfa   : > { %v3332_v35 = vpop.eup %3331  ;;  %v2343_v36 = vsel %vm803_vm7, %v3330_v34, 0.0 }
 0xcfb   : > { %3333 = vpow2.f32 %v2338_v2  ;;  %2344 = vadd.xlane.f32.xlu1 %v2343_v36  ;;  %v2346_v37 = vsel %vm803_vm7, %v3332_v35, 0.0 }
 0xcfc   : > { %2347 = vadd.xlane.f32.xlu2 %v2346_v37 }
 0xd01   : > { %v3334_v4 = vpop.eup %3333 }
 0xd02   : > { %v2349_v38 = vsel %vm803_vm7, %v3334_v4, 0.0 }
 0xd03   : > { %2350 = vadd.xlane.f32.xlu1 %v2349_v38 }
 0xd62   : > { %v2342_v5 = vpop.xlane.xlu0 %2341 }
 0xd63   : > { %3335 = vrcp.f32 %v2342_v5 }
 0xd69   : > { %v3336_v6 = vpop.eup %3335 }
 0xd6a   : > { %v2356_v7 = vmul.f32 %v3336_v6, %v3328_v23  ;;  %v3274_v6 = vld [vmem:[#allocation5 + $0x4a] ss:$0 sm:$0xff] }
 0xd6c   : > { %3123 = vmatmul.msk.f32.vlgmr.msrb.gmra.mxu1 %vm803_vm7, %v2356_v7 }
 0xd6d   : > { %2604 = vmatpush.bf16.msrb.mxu1 %v3181_v31 }
 0xd6e   : > { %v2345_v8 = vpop.xlane.xlu1 %2344 }
 0xd6f   : > { %3337 = vrcp.f32 %v2345_v8  ;;  %v2348_v18 = vpop.xlane.xlu2 %2347  ;;  %v3275_v8 = vld [vmem:[#allocation5 + $0x4b] ss:$0 sm:$0xff] }
 0xd70   : > { %3339 = vrcp.f32 %v2348_v18 }
 0xd71   : > { %2605 = vmatpush.bf16.msrb.mxu1 %v3180_v33  ;;  %v2744_v33 = vld [vmem:[%s415_s25] sm:$0xff]  ;;  %s3437_s25 = scalar_lea.hbm %s3436_s24, 8 }
 0xd72   : > { %p3438_p0 = scmp.ne.s32.totalorder %s3436_s24, %s3437_s25  ;;  %p3443_p4 = scmp.lt.s32.totalorder %s3441_s13, %s3437_s25 }
 0xd74   : > { %p3439_p1 = pnand %p3438_p0, %p3591_p5  ;;  %p3444_p7 = por %p3443_p4, %p3442_p3 }
 0xd75   : > { %v3338_v9 = vpop.eup %3337 }
 0xd76   : > { %v3340_v39 = vpop.eup %3339  ;;  %v2357_v40 = vmul.f32 %v3338_v9, %v3330_v34  ;;  %v2351_v41 = vpop.xlane.xlu1 %2350  ;;  %p3440_p2 = pneg %p3439_p1 }
 0xd77   : > { %v2358_v42 = vmul.f32 %v3340_v39, %v3332_v35  ;;  %3341 = vrcp.f32 %v2351_v41  ;;  %v3185_v41 = vld [vmem:[%s4236_s6 + $0x78] sm:$0xff] }
 0xd78   : > { %3124 = vmatmul.msk.f32.vlgmr.msra.gmra.mxu2 %vm803_vm7, %v2357_v40  ;;  %p3445_p8 = pnand %p3444_p7, %p3440_p2 }
 0xd79   : > { %3125 = vmatmul.msk.f32.vlgmr.msra.gmra.mxu3 %vm803_vm7, %v2358_v42  ;;  %2662 = vmatpush.bf16.msra.mxu2 %v3185_v41  ;;  %v3184_v42 = vld [vmem:[%s4236_s6 + $0x70] sm:$0xff] }
 0xd7d   : > { %v3342_v32 = vpop.eup %3341  ;;  %2663 = vmatpush.bf16.msra.mxu2 %v3184_v42 }
 0xd7e   : > { %v2359_v43 = vmul.f32 %v3342_v32, %v3334_v4  ;;  %v3183_v32 = vld [vmem:[%s4236_s6 + $0x68] sm:$0xff] }
 0xd80   : > { %3126 = vmatmul.msk.f32.vlgmr.msrb.gmra.mxu0 %vm803_vm7, %v2359_v43  ;;  %v3182_v43 = vld [vmem:[%s4236_s6 + $0x60] sm:$0xff] }
 0xd81   : > { %2664 = vmatpush.bf16.msra.mxu2 %v3183_v32 }
 0xd85   : > { %2665 = vmatpush.bf16.msra.mxu2 %v3182_v43 }
 0xde9   : > { %v2380_v52 = vpop.f32.mrf.mxu1 }
 0xdea   : > { %v2457_v53 = vpack.c.bf16 %v2380_v52, %v2380_v52 }
 0xdec   : > { %3131 = vmatmul.msk.bf16.vlgmr.msra.gmra.mxu1 %vm803_vm7, %v2457_v53 }
 0xdfb   : > { %v2403_v56 = vpop.f32.mrf.mxu2 }
 0xdfc   : > { %v2458_v57 = vpack.c.bf16 %v2403_v56, %v2403_v56  ;;  %v2426_v59 = vpop.f32.mrf.mxu3 }
 0xdfd   : > { %v2459_v60 = vpack.c.bf16 %v2426_v59, %v2426_v59  ;;  %v2449_v61 = vpop.f32.mrf.mxu0 }
 0xdfe   : > { %v2460_v62 = vpack.c.bf16 %v2449_v61, %v2449_v61  ;;  %3132 = vmatmul.msk.bf16.vlgmr.msrb.gmra.mxu2 %vm803_vm7, %v2458_v57  ;;  %v3277_v61 = vld [vmem:[#allocation5 + $0x52] ss:$0 sm:$0xff] }
 0xdff   : > { %3133 = vmatmul.msk.bf16.vlgmr.msrb.gmra.mxu3 %vm803_vm7, %v2459_v60 }
 0xe00   : > { %3134 = vmatmul.msk.bf16.vlgmr.msra.gmra.mxu0 %vm803_vm7, %v2460_v62 }
 0xe69   : > { %v2476_v63 = vpop.f32.mrf.mxu1 }
 0xe6a   : > { %v2537_v12 = vsel %vm517_vm2, %v2476_v63, 0.0 }
 0xe71   : > { %v2478_v26 = vpop.f32.mrf.mxu1 }
 0xe7d   : > { %v2533_v0 = vpop.f32.mrf.mxu0 }
 0xe7e   : > { %v2542_v20 = vsel %vm517_vm2, %v2533_v0, 0.0 }
 0xe81   : > { %v2495_v1 = vpop.f32.mrf.mxu2 }
 0xe82   : > { %v2538_v14 = vsel %vm517_vm2, %v2495_v1, 0.0  ;;  %v2514_v58 = vpop.f32.mrf.mxu3 }
 0xe83   : > { %v2539_v15 = vadd.f32 %v2538_v14, %v2537_v12  ;;  %v2540_v54 = vsel %vm517_vm2, %v2514_v58, 0.0  ;;  %v3353_v12 = vld [vmem:[%s4236_s6 + $0x38] sm:$0xff]  ;;  %v3354_v58 = vld [vmem:[%s4236_s6 + $0x30] sm:$0xff] }
 0xe84   : > { %v2728_v14 = vsel %vm517_vm2, %v3353_v12, 0 }
 0xe85   : > { %v2541_v16 = vadd.f32 %v2540_v54, %v2539_v15  ;;  %v2535_v17 = vpop.f32.mrf.mxu0  ;;  %2730 = vmatpush.bf16.xpose.msra.mxu3 %v2728_v14  ;;  %v2725_v15 = vsel %vm517_vm2, %v3354_v58, 0  ;;  %v3355_v54 = vld [vmem:[%s4236_s6 + $0x28] sm:$0xff] }
 0xe86   : > { %v3356_v17 = vld [vmem:[%s4236_s6 + $0x20] sm:$0xff] }
 0xe87   : > { %v2543_v21 = vadd.f32 %v2542_v20, %v2541_v16  ;;  %v2722_v16 = vsel %vm517_vm2, %v3355_v54, 0 }
 0xe89   : > { %v2497_v45 = vpop.f32.mrf.mxu2  ;;  %v2546_v22 = vadd.f32 %v3273_v19, %v2543_v21  ;;  %v2719_v19 = vsel %vm517_vm2, %v3356_v17, 0 }
 0xe8a   : > { %v2516_v23 = vpop.f32.mrf.mxu3 }
 0xe8b   : > { %v2547_v24 = vadd.f32 %v2546_v22, %v4045_v3  ;;  %v3357_v23 = vld [vmem:[%s4236_s6 + $0x18] sm:$0xff] }
 0xe8d   : > { %v2550_v27 = vsel %vm517_vm2, %v2547_v24, 0.0  ;;  %2731 = vmatpush.bf16.xpose.msra.mxu3 %v2725_v15 }
 0xe8e   : > { %2551 = vadd.xlane.f32.xlu2 %v2550_v27 }
 0xe95   : > { %2732 = vmatpush.bf16.xpose.msra.mxu3 %v2722_v16 }
 0xe9d   : > { %2733 = vmatpush.bf16.xpose.msra.mxu3 %v2719_v19 }
 0xf01   : > { %v2552_v28 = vpop.xlane.xlu2 %2551 }
 0xf02   : > { %v2553_v29 = vmul.f32 %v2552_v28, %v3691_v25  ;;  %v3358_v28 = vld [vmem:[%s4236_s6 + $0x10] sm:$0xff] }
 0xf04   : > { %v2554_v30 = vsub.f32 %v2547_v24, %v2553_v29  ;;  %v2716_v24 = vsel %vm517_vm2, %v3357_v23, 0  ;;  %v2713_v29 = vsel %vm517_vm2, %v3358_v28, 0 }
 0xf05   : > { %2734 = vmatpush.bf16.xpose.msra.mxu3 %v2716_v24 }
 0xf06   : > { %v2555_v55 = vmul.f32 %v2554_v30, %v2554_v30 }
 0xf08   : > { %v2556_v10 = vsel %vm517_vm2, %v2555_v55, 0.0 }
 0xf09   : > { %2557 = vadd.xlane.f32.xlu0 %v2556_v10  ;;  %v3360_v10 = vld [vmem:[%s4236_s6] sm:$0xff] }
 0xf0a   : > { %v2707_v31 = vsel %vm517_vm2, %v3360_v10, 0 }
 0xf0d   : > { %2735 = vmatpush.bf16.xpose.msra.mxu3 %v2713_v29 }
 0xf7c   : > { %v2558_v34 = vpop.xlane.xlu0 %2557 }
 0xf7d   : > { %v2559_v2 = vmul.f32 %v2558_v34, %v3691_v25 }
 0xf7f   : > { %v2560_v35 = vadd.f32 1e-05, %v2559_v2 }
 0xf81   : > { %3343 = vrsqrt.f32 %v2560_v35  ;;  %vm2567_vm8 = vweird.f32 %v2560_v35 }
 0xf87   : > { %v3344_v3 = vpop.eup %3343 }
 0xf88   : > { %v2562_v36 = vmul.f32 %v3344_v3, %v2560_v35  ;;  %vm2568_vm7 = vweird.f32 %v3344_v3 }
 0xf89   : > { %vm2569_vm12 = vmor %vm2567_vm8, %vm2568_vm7 }
 0xf8a   : > { %v2563_v37 = vmul.f32 %v3344_v3, %v2562_v36 }
 0xf8c   : > { %v2564_v4 = vmul.f32 0.5, %v2563_v37 }
 0xf8e   : > { %v2565_v38 = vsub.f32 1.5, %v2564_v4 }
 0xf90   : > { %v2566_v5 = vmul.f32 %v3344_v3, %v2565_v38 }
 0xf92   : > { %v2570_v7 = vsel %vm2569_vm12, %v3344_v3, %v2566_v5 }
 0xf93   : > { %v2571_v18 = vmul.f32 %v2570_v7, %v2554_v30  ;;  %v3359_v30 = vld [vmem:[%s4236_s6 + $0x8] sm:$0xff] }
 0xf94   : > { %v2710_v55 = vsel %vm517_vm2, %v3359_v30, 0 }
 0xf95   : > { %v2573_v9 = vmul.f32 %v3274_v6, %v2571_v18  ;;  %2736 = vmatpush.bf16.xpose.msra.mxu3 %v2710_v55  ;;  %v3278_v6 = vld [vmem:[#allocation5 + $0x4c] ss:$0 sm:$0xff] }
 0xf97   : > { %v2575_v39 = vadd.f32 %v3275_v8, %v2573_v9  ;;  %v3279_v8 = vld [vmem:[#allocation5 + $0x4d] ss:$0 sm:$0xff] }
 0xf99   : > { %v2580_v40 = vpack.c.bf16 %v2575_v39, %v2575_v39 }
 0xf9b   : > { %3143 = vmatmul.msk.bf16.vlgmr.msrb.gmra.mxu1 %vm517_vm2, %v2580_v40  ;;  %v3280_v40 = vld [vmem:[#allocation5 + $0x55] ss:$0 sm:$0xff] }
 0xf9d   : > { %2737 = vmatpush.bf16.xpose.msra.mxu3 %v2707_v31 }
0x1018   : > { %v2607_v46 = vpop.f32.mrf.mxu1 }
0x1019   : > { %v2608_v47 = vadd.f32 %v3276_v44, %v2607_v46 }
0x101b   : > { %v2612_v48 = vmul.f32 0.044715, %v2608_v47  ;;  %v2611_v56 = vmul.f32 0.5, %v2608_v47 }
0x101d   : > { %v2613_v49 = vmul.f32 %v2612_v48, %v2608_v47 }
0x101f   : > { %v2614_v50 = vmul.f32 %v2613_v49, %v2608_v47 }
0x1020   : > { %v2609_v13 = vpop.f32.mrf.mxu1 }
0x1021   : > { %v2615_v51 = vadd.f32 %v2614_v50, %v2608_v47 }
0x1023   : > { %v2616_v52 = vmul.f32 0.7978846, %v2615_v51 }
0x1025   : > { %3345 = vtanh.f32 %v2616_v52 }
0x102b   : > { %v3346_v53 = vpop.eup %3345 }
0x102c   : > { %v2618_v57 = vadd.f32 1.0, %v3346_v53 }
0x102e   : > { %v2619_v59 = vmul.f32 %v2618_v57, %v2611_v56 }
0x1030   : > { %v2628_v60 = vpack.c.bf16 %v2619_v59, %v2619_v59 }
0x1032   : > { %3160 = vmatmul.msk.bf16.vlgmr.msra.gmra.mxu2 %vm1248_vm1, %v2628_v60 }
0x10b5   : > { %v2667_v62 = vpop.f32.mrf.mxu2 }
0x10b6   : > { %v2668_v63 = vadd.f32 %v3277_v61, %v2667_v62 }
0x10b8   : > { %v2671_v26 = vadd.f32 %v2668_v63, %v2575_v39 }
0x10ba   : > { %v2674_v0 = vsel %vm517_vm2, %v2671_v26, 0.0 }
0x10bb   : > { %2675 = vadd.xlane.f32.xlu1 %v2674_v0 }
0x10bd   : > { %v2669_v1 = vpop.f32.mrf.mxu2 }
0x10d4   : > { %2756 = vperm.xlu1 %3258, %v2744_v33  }
0x112e   : > { %v2676_v20 = vpop.xlane.xlu1 %2675 }
0x112f   : > { %v2677_v21 = vmul.f32 %v2676_v20, %v3691_v25 }
0x1131   : > { %v2678_v45 = vsub.f32 %v2671_v26, %v2677_v21 }
0x1133   : > { %v2679_v22 = vmul.f32 %v2678_v45, %v2678_v45 }
0x1135   : > { %v2680_v27 = vsel %vm517_vm2, %v2679_v22, 0.0 }
0x1136   : > { %2681 = vadd.xlane.f32.xlu2 %v2680_v27 }
0x1146   : > { %v2757_v32 = vpop.permute.xlu1 %2756 }
0x1147   : > { %vm2758_vm0 = vcmp.eq.s32.totalorder %v3686_v11, %v2757_v32 }
0x11a9   : > { %v2682_v34 = vpop.xlane.xlu2 %2681 }
0x11aa   : > { %v2683_v2 = vmul.f32 %v2682_v34, %v3691_v25 }
0x11ac   : > { %v2684_v35 = vadd.f32 1e-05, %v2683_v2 }
0x11ae   : > { %3347 = vrsqrt.f32 %v2684_v35  ;;  %vm2691_vm14 = vweird.f32 %v2684_v35 }
0x11b4   : > { %v3348_v3 = vpop.eup %3347 }
0x11b5   : > { %v2686_v36 = vmul.f32 %v3348_v3, %v2684_v35  ;;  %vm2692_vm13 = vweird.f32 %v3348_v3 }
0x11b6   : > { %vm2693_vm15 = vmor %vm2691_vm14, %vm2692_vm13 }
0x11b7   : > { %v2687_v37 = vmul.f32 %v3348_v3, %v2686_v36 }
0x11b9   : > { %v2688_v4 = vmul.f32 0.5, %v2687_v37 }
0x11bb   : > { %v2689_v38 = vsub.f32 1.5, %v2688_v4 }
0x11bd   : > { %v2690_v5 = vmul.f32 %v3348_v3, %v2689_v38 }
0x11bf   : > { %v2694_v7 = vsel %vm2693_vm15, %v3348_v3, %v2690_v5 }
0x11c0   : > { %v2695_v18 = vmul.f32 %v2694_v7, %v2678_v45 }
0x11c2   : > { %v2697_v9 = vmul.f32 %v3278_v6, %v2695_v18 }
0x11c4   : > { %v2699_v39 = vadd.f32 %v3279_v8, %v2697_v9 }
0x11c6   : > { %v2700_v25 = vpack.c.bf16 %v2699_v39, %v2699_v39 }
0x11c8   : > { %3161 = vmatmul.msk.bf16.vlgmr.msra.gmra.mxu3 %vm517_vm2, %v2700_v25  ;;  %vm2763_vm2 = vcmask 7168  }
0x124b   : > { %v2739_v41 = vpop.f32.mrf.mxu3 }
0x124c   : > { %v2740_v42 = vadd.f32 %v3280_v40, %v2739_v41 }
0x124e   : > { %2745 = vmax.xlane.f32.xlu0 %v2740_v42  ;;  %2743 = vst [vmem:[%s400_s27] sm:$0xff] %v2740_v42  ;;  %v2759_v44 = vsel %vm2758_vm0, %v2740_v42, 0.0 }
0x1253   : > { %v2741_v43 = vpop.f32.mrf.mxu3 }
0x1256   : > { %2760 = vadd.xlane.f32.xlu0 %v2759_v44 }
0x12c1   : > { %v2746_v46 = vpop.xlane.xlu0 %2745 }
0x12c2   : > { %v2747_v47 = vsub.f32 %v2740_v42, %v2746_v46 }
0x12c4   : > { %v2748_v48 = vmul.f32 1.442695, %v2747_v47 }
0x12c6   : > { %3349 = vpow2.f32 %v2748_v48 }
0x12c9   : > { %v2761_v53 = vpop.xlane.xlu0 %2760 }
0x12cc   : > { %v3350_v49 = vpop.eup %3349 }
0x12cd   : > { %2750 = vadd.xlane.f32.xlu2 %v3350_v49 }
0x1340   : > { %v2751_v50 = vpop.xlane.xlu2 %2750 }
0x1341   : > { %3351 = vlog2.f32 %v2751_v50 }
0x1347   : > { %v3352_v13 = vpop.eup %3351 }
0x1348   : > { %v2753_v51 = vmul.f32 0.6931472, %v3352_v13 }
0x134a   : > { %v2754_v52 = vadd.f32 %v2753_v51, %v2746_v46 }
0x134c   : > { %v2762_v11 = vsub.f32 %v2754_v52, %v2761_v53 }
0x134e   : > { %v2764_v56 = vsel %vm2763_vm2, %v2762_v11, 0.0 }
0x134f   : > { %2765 = vadd.xlane.f32.xlu2 %v2764_v56 }
0x1350   : > { %3448 = shalt.err (!%p3445_p8)
}
0x1351   : > { %3196 = dma.vmem_to_hbm [thread:$0]  (%p3591_p5), %s2796_s17, 128, %s2798_s22, %s2780_s23  }
0x1352   : > { %s418_s1 = scalar_lea.vmem %s4238_s8, %s3628_s5 }
0x13c2   : > { %v2766_v57 = vpop.xlane.xlu2 %2765 }
0x13c3   : > { %v2767_v59 = vrot.slane %v2766_v57, 4 }
0x13c5   : > { %v2768_v60 = vadd.f32 %v2767_v59, %v2766_v57 }
0x13c7   : > { %v2769_v61 = vrot.slane %v2768_v60, 2 }
0x13c9   : > { %v2770_v62 = vadd.f32 %v2769_v61, %v2768_v60 }
0x13cb   : > { %v2771_v63 = vrot.slane %v2770_v62, 1 }
0x13cd   : > { %v2772_v26 = vadd.f32 %v2771_v63, %v2770_v62 }
0x13cf   : > { %3186 = vpush %v2772_v26 }
0x1400   : > { %s3187_s27 = spop %3186 }
0x1401   : > { %v2774_v0 = vstv %s3187_s27 }
0x1402   : > { %2775 = vst [vmem:[%s418_s1] sm:$0x1] %v2774_v0 }
0x1403 PF: > { %p3213_p5 = scmp.ge.s32.totalorder %s3491_s12, 2  ;;  %s2815_s19 = sand.u32 1, %s3479_s30  }
0x1404   : > { %s2816_s28 = scalar_lea.sflag [#allocation4], %s2815_s19 }
0x1405   : > { %p3206_p9 = pnand %p3213_p5, %p3595_p6 }
0x1407   : > { %p3207_p10 = pneg %p3206_p9 }
0x1409   : > { %3474 = dma.done.wait (%p3207_p10), %s2816_s28, 128  }
0x140a   : > { %3476 = vsyncadd (%p3207_p10), %s2816_s28, 4294967168  ;;  %p22_p11 = scmp.ge.s32.totalorder %s3578_s15, 4   ;;  %s4249_s30 = smov %s3483_s10 }
0x140b   : > { %s4250_s10 = smov %s3487_s11  ;;  %s4251_s11 = smov %s3589_s18 }
0x140c   : > { %s4252_s12 = smov %s3578_s15  ;;  %24 = sbr.rel (!%p22_p11) target bundleno = 9 (0x9), region = 128 }
0x1411   :  { %2822 = vsyncpa [#allocation3], 1 }
0x1412   :  { %2824 = vsyncpa [#allocation3 + $0x1], 1 }
0x1413   :  { %2825 = vsyncpa [#allocation6], 1 }
0x1414   :  { %2826 = vsyncpa [#allocation4], 1 }
0x1415   :  { %2828 = vsyncpa [#allocation4 + $0x1], 1 }

</bundles_post_ra>
